<compile_context>
chip_gen: v7x
topology: tpu7x:2x2x1
jax: 0.10.0
libtpu: 0.0.40
codegen_flags: <defaults>
</compile_context>

<pallas_src>
import functools

import jax
import jax.numpy as jnp
from jax import lax
from jax.experimental import pallas as pl
from jax.experimental.pallas import tpu as pltpu


def _round_up(v, m):
    return (v + m - 1) // m * m


def _vat_kernel(seed_ref, x_ref, w1_ref, b1_ref, w2_ref, b2_ref,
                w1t_ref, w2t_ref, out_ref, *, xi, eps, ip, d_real):
    x = x_ref[...]           # (TB, Dp)  f32 batch tile
    w1 = w1_ref[...]         # (Dp, H1p) bf16, VMEM-resident
    b1 = b1_ref[...]         # (1, H1p)  f32
    w2 = w2_ref[...]         # (H1p, Kp) bf16, VMEM-resident
    b2 = b2_ref[...]         # (1, Kp)   f32 (-1e9 on padded class lanes)
    w1t = w1t_ref[...]       # (H1p, Dp) bf16, pre-transposed (backward)
    w2t = w2t_ref[...]       # (Kp, H1p) bf16, pre-transposed (backward)

    tb, dp = x.shape

    # ---- d = rand(x.shape) - 0.5, generated on-chip ------------------------
    # murmur3-style integer hash of the global element index + seed: portable
    # (plain jnp integer ops lower on Mosaic AND in interpret mode, unlike the
    # hardware PRNG primitives), and nothing is streamed from HBM.  Scale and
    # offset of the raw values are irrelevant: d is immediately l2-normalized.
    # TODO(synk): RNG stream differs from torch.rand (statistically equivalent).
    row = lax.broadcasted_iota(jnp.int32, (tb, dp), 0) + pl.program_id(0) * tb
    col = lax.broadcasted_iota(jnp.int32, (tb, dp), 1)
    h = (row * jnp.int32(dp) + col + seed_ref[0]).astype(jnp.uint32)
    h = h ^ (h >> 16)
    h = h * jnp.uint32(0x85EBCA6B)
    h = h ^ (h >> 13)
    h = h * jnp.uint32(0xC2B2AE35)
    h = h ^ (h >> 16)
    # keep 31 bits, convert, and center -> symmetric zero-mean random values
    d = (h & jnp.uint32(0x7FFFFFFF)).astype(jnp.int32).astype(jnp.float32) \
        - 1073741824.0

    if dp > d_real:
        # static: only emitted when D is not a multiple of 128.  Zero padded
        # feature lanes so they don't bias the per-sample norm (reuses `col`).
        d = jnp.where(col < d_real, d, 0.0)

    # torch _l2_normalize: one EUP rsqrt instead of sqrt -> reciprocal chain
    d = d * lax.rsqrt(jnp.sum(d * d, axis=1, keepdims=True) + 1e-12)

    def forward(z):
        # bf16 MXU inputs, f32 accumulation; elementwise math stays f32.
        pre = jnp.dot(z.astype(jnp.bfloat16), w1,
                      preferred_element_type=jnp.float32) + b1
        hid = jnp.maximum(pre, 0.0)
        logits = jnp.dot(hid.astype(jnp.bfloat16), w2,
                         preferred_element_type=jnp.float32) + b2
        return pre, logits

    def softmax(logits):
        m = jnp.max(logits, axis=1, keepdims=True)
        e = jnp.exp(logits - m)
        return e / jnp.sum(e, axis=1, keepdims=True)   # exact (torch parity)

    # with torch.no_grad(): pred = softmax(modelC(modelF(x)), dim=1)
    _, logits0 = forward(x)
    pred = softmax(logits0)

    # TODO(synk): _disable_tracking_bn_stats has no effect — the synthetic
    # modelF contains no BatchNorm layers.
    for _ in range(ip):  # ip is a small static constant (default 1)
        pre, logits = forward(x + xi * d)
        q = softmax(logits)
        # Analytic grad of F.kl_div(log_softmax(logits), pred, 'batchmean')
        # w.r.t. logits is (q - pred)/B; the positive scalars 1/B and xi
        # cancel under the following l2 normalization, so they are dropped.
        g_logits = q - pred
        # Backward matmuls with pre-transposed resident weights: no in-kernel
        # transpose / relayout of the loop-invariant w1 / w2.
        g_h = jnp.dot(g_logits.astype(jnp.bfloat16), w2t,
                      preferred_element_type=jnp.float32)
        g_pre = jnp.where(pre > 0.0, g_h, 0.0)           # ReLU backward
        g_z = jnp.dot(g_pre.astype(jnp.bfloat16), w1t,
                      preferred_element_type=jnp.float32)
        d = g_z * lax.rsqrt(jnp.sum(g_z * g_z, axis=1, keepdims=True) + 1e-12)

    # r_adv = d * eps ; x_pert = x + r_adv
    out_ref[...] = x + eps * d


def vat_perturb(x, w1, b1, w2, b2, *, xi=10.0, eps=1.0, ip=1, seed=0,
                tile_b=None):
    """x: (B, C, H, W) f32.  Returns x_pert with the same NCHW shape."""
    B = x.shape[0]
    D = x.size // B
    H1 = w1.shape[1]
    K = w2.shape[1]

    # ---- adaptive batch tiling ---------------------------------------------
    # Size the tile to the real batch (f32 sublane granularity = 8) and balance
    # the tiles so a small remainder never costs a whole redundant 128-row tile.
    if tile_b is None:
        n_guess = pl.cdiv(B, 128)
        tile_b = min(128, _round_up(pl.cdiv(B, n_guess), 8))
    Bp = _round_up(B, tile_b)
    n_tiles = Bp // tile_b
    # v7x has 2 TensorCores: give the "parallel" axis >= 2 steps when possible
    # (near-no-op on single-TC v5e/v6e: one extra ~0.35us grid step).
    if n_tiles == 1 and tile_b >= 16:
        tile_b = _round_up(tile_b // 2, 8)
        Bp = _round_up(B, tile_b)
        n_tiles = Bp // tile_b

    Dp = _round_up(D, 128)
    H1p = _round_up(H1, 128)
    Kp = _round_up(K, 128)

    xf = jnp.zeros((Bp, Dp), jnp.float32).at[:B, :D].set(
        x.reshape(B, D).astype(jnp.float32))
    w1p = jnp.zeros((Dp, H1p), jnp.bfloat16).at[:D, :H1].set(
        w1.astype(jnp.bfloat16))
    b1p = jnp.zeros((1, H1p), jnp.float32).at[0, :H1].set(
        b1.astype(jnp.float32))
    w2p = jnp.zeros((H1p, Kp), jnp.bfloat16).at[:H1, :K].set(
        w2.astype(jnp.bfloat16))
    # padded class lanes get a large negative bias so softmax assigns them ~0
    b2p = jnp.full((1, Kp), -1e9, jnp.float32).at[0, :K].set(
        b2.astype(jnp.float32))
    # pre-transposed copies for the backward matmuls, hoisted out of the kernel
    w1tp = w1p.T
    w2tp = w2p.T
    seed_arr = jnp.array([seed], jnp.int32)

    kernel = functools.partial(_vat_kernel, xi=xi, eps=eps, ip=ip, d_real=D)

    # scoped-VMEM budget from the actual footprint: double-buffered f32 x/out
    # tiles + double-buffered bf16 weights (incl. transposes) + headroom for
    # the in-kernel (tile_b, Dp) f32 temporaries.
    weight_bytes = 2 * 2 * (Dp * H1p + H1p * Dp + H1p * Kp + Kp * H1p)
    tile_bytes = 2 * 2 * tile_b * Dp * 4
    temp_bytes = 8 * tile_b * Dp * 4
    vmem_limit = int(min(max(weight_bytes + tile_bytes + temp_bytes + (1 << 21),
                             32 * 1024 * 1024), 128 * 1024 * 1024))
    # NOTE: for very large D, additionally single-buffer the resident weight
    # specs (pipeline_mode=pl.Buffered(1)) or stream w1/w1^T over a feature-dim
    # grid axis to stay inside v7x's 64 MiB VMEM.

    out = pl.pallas_call(
        kernel,
        out_shape=jax.ShapeDtypeStruct((Bp, Dp), jnp.float32),
        grid_spec=pltpu.PrefetchScalarGridSpec(
            num_scalar_prefetch=1,
            grid=(n_tiles,),
            in_specs=[
                pl.BlockSpec((tile_b, Dp), lambda i, s: (i, 0)),   # x tile
                pl.BlockSpec((Dp, H1p), lambda i, s: (0, 0)),      # w1   (resident)
                pl.BlockSpec((1, H1p), lambda i, s: (0, 0)),       # b1
                pl.BlockSpec((H1p, Kp), lambda i, s: (0, 0)),      # w2   (resident)
                pl.BlockSpec((1, Kp), lambda i, s: (0, 0)),        # b2
                pl.BlockSpec((H1p, Dp), lambda i, s: (0, 0)),      # w1^T (resident)
                pl.BlockSpec((Kp, H1p), lambda i, s: (0, 0)),      # w2^T (resident)
            ],
            out_specs=pl.BlockSpec((tile_b, Dp), lambda i, s: (i, 0)),
        ),
        compiler_params=pltpu.CompilerParams(
            dimension_semantics=("parallel",),
            vmem_limit_bytes=vmem_limit),
    )(seed_arr, xf, w1p, b1p, w2p, b2p, w1tp, w2tp)
    return out[:B, :D].reshape(x.shape)


if __name__ == "__main__":
    key = jax.random.PRNGKey(0)
    kx, k1, k2, k3, k4 = jax.random.split(key, 5)

    # small shapes consistent with an NCHW image input
    B, C, H, W = 2, 4, 16, 16
    D = C * H * W
    H1, K = 32, 8          # hidden width of modelF, num classes of modelC

    x = jax.random.normal(kx, (B, C, H, W), jnp.float32)

    # deterministic synthetic parameters (no checkpoint loading)
    w1 = jax.random.normal(k1, (D, H1), jnp.float32) * (1.0 / jnp.sqrt(D))
    b1 = jax.random.normal(k2, (H1,), jnp.float32) * 0.01
    w2 = jax.random.normal(k3, (H1, K), jnp.float32) * (1.0 / jnp.sqrt(H1))
    b2 = jax.random.normal(k4, (K,), jnp.float32) * 0.01

    x_pert = vat_perturb(x, w1, b1, w2, b2, xi=10.0, eps=1.0, ip=1, seed=0)
    jax.block_until_ready(x_pert)
    assert x_pert.shape == x.shape and x_pert.dtype == jnp.float32
    assert bool(jnp.all(jnp.isfinite(x_pert)))
    print("KERNEL_OK")
</pallas_src>

<mosaic_0001>
module attributes {stable_mosaic.version = 11 : i64} {
  func.func @_vat_kernel(%arg0: i32, %arg1: memref<1xi32, #tpu.memory_space<smem>>, %arg2: memref<8x1024xf32, #tpu.memory_space<vmem>>, %arg3: memref<1024x128xbf16, #tpu.memory_space<vmem>>, %arg4: memref<1x128xf32, #tpu.memory_space<vmem>>, %arg5: memref<128x128xbf16, #tpu.memory_space<vmem>>, %arg6: memref<1x128xf32, #tpu.memory_space<vmem>>, %arg7: memref<128x1024xbf16, #tpu.memory_space<vmem>>, %arg8: memref<128x128xbf16, #tpu.memory_space<vmem>>, %arg9: memref<8x1024xf32, #tpu.memory_space<vmem>>) attributes {dimension_semantics = [#tpu.dimension_semantics<parallel>], iteration_bounds = array<i64: 1>, scalar_prefetch = 1 : i64, scratch_operands = 0 : i64, tpu.core_type = #tpu.core_type<tc>, window_params = [{transform_indices = @transform_0, window_bounds = array<i64: 8, 1024>}, {pipeline_mode = #tpu.pipeline_mode<synchronous>, transform_indices = @transform_1, window_bounds = array<i64: 1024, 128>}, {pipeline_mode = #tpu.pipeline_mode<synchronous>, transform_indices = @transform_2, window_bounds = array<i64: 1, 128>}, {pipeline_mode = #tpu.pipeline_mode<synchronous>, transform_indices = @transform_3, window_bounds = array<i64: 128, 128>}, {pipeline_mode = #tpu.pipeline_mode<synchronous>, transform_indices = @transform_4, window_bounds = array<i64: 1, 128>}, {pipeline_mode = #tpu.pipeline_mode<synchronous>, transform_indices = @transform_5, window_bounds = array<i64: 128, 1024>}, {pipeline_mode = #tpu.pipeline_mode<synchronous>, transform_indices = @transform_6, window_bounds = array<i64: 128, 128>}, {transform_indices = @transform_7, window_bounds = array<i64: 8, 1024>}]} {
    %c0 = arith.constant 0 : index
    %c0_0 = arith.constant 0 : index
    %0 = vector.load %arg2[%c0, %c0_0] : memref<8x1024xf32, #tpu.memory_space<vmem>>, vector<8x1024xf32>
    %c0_1 = arith.constant 0 : index
    %c0_2 = arith.constant 0 : index
    %1 = vector.load %arg3[%c0_1, %c0_2] : memref<1024x128xbf16, #tpu.memory_space<vmem>>, vector<1024x128xbf16>
    %c0_3 = arith.constant 0 : index
    %c0_4 = arith.constant 0 : index
    %2 = vector.load %arg4[%c0_3, %c0_4] : memref<1x128xf32, #tpu.memory_space<vmem>>, vector<1x128xf32>
    %c0_5 = arith.constant 0 : index
    %c0_6 = arith.constant 0 : index
    %3 = vector.load %arg5[%c0_5, %c0_6] : memref<128x128xbf16, #tpu.memory_space<vmem>>, vector<128x128xbf16>
    %c0_7 = arith.constant 0 : index
    %c0_8 = arith.constant 0 : index
    %4 = vector.load %arg6[%c0_7, %c0_8] : memref<1x128xf32, #tpu.memory_space<vmem>>, vector<1x128xf32>
    %c0_9 = arith.constant 0 : index
    %c0_10 = arith.constant 0 : index
    %5 = vector.load %arg7[%c0_9, %c0_10] : memref<128x1024xbf16, #tpu.memory_space<vmem>>, vector<128x1024xbf16>
    %c0_11 = arith.constant 0 : index
    %c0_12 = arith.constant 0 : index
    %6 = vector.load %arg8[%c0_11, %c0_12] : memref<128x128xbf16, #tpu.memory_space<vmem>>, vector<128x128xbf16>
    %7 = tpu.iota {dimensions = array<i32: 0>} : vector<8x1024xi32>
    %c8_i32 = arith.constant 8 : i32
    %8 = arith.muli %arg0, %c8_i32 : i32
    %9 = vector.broadcast %8 : i32 to vector<8x1024xi32>
    %10 = arith.addi %7, %9 : vector<8x1024xi32>
    %11 = tpu.iota {dimensions = array<i32: 1>} : vector<8x1024xi32>
    %c1024_i32 = arith.constant 1024 : i32
    %12 = vector.broadcast %c1024_i32 : i32 to vector<8x1024xi32>
    %13 = arith.muli %10, %12 : vector<8x1024xi32>
    %14 = arith.addi %13, %11 : vector<8x1024xi32>
    %c0_13 = arith.constant 0 : index
    %15 = memref.load %arg1[%c0_13] : memref<1xi32, #tpu.memory_space<smem>>
    %16 = vector.broadcast %15 : i32 to vector<8x1024xi32>
    %17 = arith.addi %14, %16 : vector<8x1024xi32>
    %c16_i32 = arith.constant 16 : i32
    %18 = vector.broadcast %c16_i32 : i32 to vector<8x1024xi32>
    %19 = arith.shrui %17, %18 : vector<8x1024xi32>
    %20 = arith.xori %17, %19 : vector<8x1024xi32>
    %c-2048144789_i32 = arith.constant -2048144789 : i32
    %21 = vector.broadcast %c-2048144789_i32 : i32 to vector<8x1024xi32>
    %22 = arith.muli %20, %21 : vector<8x1024xi32>
    %c13_i32 = arith.constant 13 : i32
    %23 = vector.broadcast %c13_i32 : i32 to vector<8x1024xi32>
    %24 = arith.shrui %22, %23 : vector<8x1024xi32>
    %25 = arith.xori %22, %24 : vector<8x1024xi32>
    %c-1028477387_i32 = arith.constant -1028477387 : i32
    %26 = vector.broadcast %c-1028477387_i32 : i32 to vector<8x1024xi32>
    %27 = arith.muli %25, %26 : vector<8x1024xi32>
    %c16_i32_14 = arith.constant 16 : i32
    %28 = vector.broadcast %c16_i32_14 : i32 to vector<8x1024xi32>
    %29 = arith.shrui %27, %28 : vector<8x1024xi32>
    %30 = arith.xori %27, %29 : vector<8x1024xi32>
    %c2147483647_i32 = arith.constant 2147483647 : i32
    %31 = vector.broadcast %c2147483647_i32 : i32 to vector<8x1024xi32>
    %32 = arith.andi %30, %31 : vector<8x1024xi32>
    %33 = arith.sitofp %32 : vector<8x1024xi32> to vector<8x1024xf32>
    %cst = arith.constant 1.07374182E+9 : f32
    %34 = vector.broadcast %cst : f32 to vector<8x1024xf32>
    %35 = arith.subf %33, %34 : vector<8x1024xf32>
    %36 = arith.mulf %35, %35 : vector<8x1024xf32>
    %cst_15 = arith.constant dense<0.000000e+00> : vector<8xf32>
    %37 = vector.multi_reduction <add>, %36, %cst_15 [1] : vector<8x1024xf32> to vector<8xf32>
    %38 = vector.shape_cast %37 : vector<8xf32> to vector<8x1xf32>
    %cst_16 = arith.constant 9.99999996E-13 : f32
    %39 = vector.broadcast %cst_16 : f32 to vector<8x1xf32>
    %40 = arith.addf %38, %39 : vector<8x1xf32>
    %41 = math.rsqrt %40 : vector<8x1xf32>
    %42 = vector.broadcast %41 : vector<8x1xf32> to vector<8x1024xf32>
    %43 = arith.mulf %35, %42 : vector<8x1024xf32>
    %44 = arith.truncf %0 : vector<8x1024xf32> to vector<8x1024xbf16>
    %cst_17 = arith.constant dense<0.000000e+00> : vector<8x128xf32>
    %45 = tpu.matmul %44, %1, %cst_17 {dimension_numbers = #tpu.dot_dimension_numbers<[1], [0], [0], [1], [0, 0, 1, 1], [], []>} : vector<8x1024xbf16>, vector<1024x128xbf16>, vector<8x128xf32> -> vector<8x128xf32>
    %46 = vector.broadcast %2 : vector<1x128xf32> to vector<8x128xf32>
    %47 = arith.addf %45, %46 : vector<8x128xf32>
    %cst_18 = arith.constant 0.000000e+00 : f32
    %48 = vector.broadcast %cst_18 : f32 to vector<8x128xf32>
    %49 = arith.maximumf %47, %48 : vector<8x128xf32>
    %50 = arith.truncf %49 : vector<8x128xf32> to vector<8x128xbf16>
    %cst_19 = arith.constant dense<0.000000e+00> : vector<8x128xf32>
    %51 = tpu.matmul %50, %3, %cst_19 {dimension_numbers = #tpu.dot_dimension_numbers<[1], [0], [0], [1], [0, 0, 1, 1], [], []>} : vector<8x128xbf16>, vector<128x128xbf16>, vector<8x128xf32> -> vector<8x128xf32>
    %52 = vector.broadcast %4 : vector<1x128xf32> to vector<8x128xf32>
    %53 = arith.addf %51, %52 : vector<8x128xf32>
    %cst_20 = arith.constant dense<0xFF800000> : vector<8xf32>
    %54 = vector.multi_reduction <maximumf>, %53, %cst_20 [1] : vector<8x128xf32> to vector<8xf32>
    %55 = vector.shape_cast %54 : vector<8xf32> to vector<8x1xf32>
    %56 = vector.broadcast %55 : vector<8x1xf32> to vector<8x128xf32>
    %57 = arith.subf %53, %56 : vector<8x128xf32>
    %58 = math.exp %57 : vector<8x128xf32>
    %cst_21 = arith.constant dense<0.000000e+00> : vector<8xf32>
    %59 = vector.multi_reduction <add>, %58, %cst_21 [1] : vector<8x128xf32> to vector<8xf32>
    %60 = vector.shape_cast %59 : vector<8xf32> to vector<8x1xf32>
    %61 = vector.broadcast %60 : vector<8x1xf32> to vector<8x128xf32>
    %62 = arith.divf %58, %61 : vector<8x128xf32>
    %cst_22 = arith.constant 1.000000e+01 : f32
    %63 = vector.broadcast %cst_22 : f32 to vector<8x1024xf32>
    %64 = arith.mulf %63, %43 : vector<8x1024xf32>
    %65 = arith.addf %0, %64 : vector<8x1024xf32>
    %66 = arith.truncf %65 : vector<8x1024xf32> to vector<8x1024xbf16>
    %cst_23 = arith.constant dense<0.000000e+00> : vector<8x128xf32>
    %67 = tpu.matmul %66, %1, %cst_23 {dimension_numbers = #tpu.dot_dimension_numbers<[1], [0], [0], [1], [0, 0, 1, 1], [], []>} : vector<8x1024xbf16>, vector<1024x128xbf16>, vector<8x128xf32> -> vector<8x128xf32>
    %68 = vector.broadcast %2 : vector<1x128xf32> to vector<8x128xf32>
    %69 = arith.addf %67, %68 : vector<8x128xf32>
    %cst_24 = arith.constant 0.000000e+00 : f32
    %70 = vector.broadcast %cst_24 : f32 to vector<8x128xf32>
    %71 = arith.maximumf %69, %70 : vector<8x128xf32>
    %72 = arith.truncf %71 : vector<8x128xf32> to vector<8x128xbf16>
    %cst_25 = arith.constant dense<0.000000e+00> : vector<8x128xf32>
    %73 = tpu.matmul %72, %3, %cst_25 {dimension_numbers = #tpu.dot_dimension_numbers<[1], [0], [0], [1], [0, 0, 1, 1], [], []>} : vector<8x128xbf16>, vector<128x128xbf16>, vector<8x128xf32> -> vector<8x128xf32>
    %74 = vector.broadcast %4 : vector<1x128xf32> to vector<8x128xf32>
    %75 = arith.addf %73, %74 : vector<8x128xf32>
    %cst_26 = arith.constant dense<0xFF800000> : vector<8xf32>
    %76 = vector.multi_reduction <maximumf>, %75, %cst_26 [1] : vector<8x128xf32> to vector<8xf32>
    %77 = vector.shape_cast %76 : vector<8xf32> to vector<8x1xf32>
    %78 = vector.broadcast %77 : vector<8x1xf32> to vector<8x128xf32>
    %79 = arith.subf %75, %78 : vector<8x128xf32>
    %80 = math.exp %79 : vector<8x128xf32>
    %cst_27 = arith.constant dense<0.000000e+00> : vector<8xf32>
    %81 = vector.multi_reduction <add>, %80, %cst_27 [1] : vector<8x128xf32> to vector<8xf32>
    %82 = vector.shape_cast %81 : vector<8xf32> to vector<8x1xf32>
    %83 = vector.broadcast %82 : vector<8x1xf32> to vector<8x128xf32>
    %84 = arith.divf %80, %83 : vector<8x128xf32>
    %85 = arith.subf %84, %62 : vector<8x128xf32>
    %86 = arith.truncf %85 : vector<8x128xf32> to vector<8x128xbf16>
    %cst_28 = arith.constant dense<0.000000e+00> : vector<8x128xf32>
    %87 = tpu.matmul %86, %6, %cst_28 {dimension_numbers = #tpu.dot_dimension_numbers<[1], [0], [0], [1], [0, 0, 1, 1], [], []>} : vector<8x128xbf16>, vector<128x128xbf16>, vector<8x128xf32> -> vector<8x128xf32>
    %cst_29 = arith.constant 0.000000e+00 : f32
    %88 = vector.broadcast %cst_29 : f32 to vector<8x128xf32>
    %89 = arith.cmpf ogt, %69, %88 : vector<8x128xf32>
    %cst_30 = arith.constant 0.000000e+00 : f32
    %90 = vector.broadcast %cst_30 : f32 to vector<8x128xf32>
    %91 = arith.select %89, %87, %90 : vector<8x128xi1>, vector<8x128xf32>
    %92 = arith.truncf %91 : vector<8x128xf32> to vector<8x128xbf16>
    %cst_31 = arith.constant dense<0.000000e+00> : vector<8x1024xf32>
    %93 = tpu.matmul %92, %5, %cst_31 {dimension_numbers = #tpu.dot_dimension_numbers<[1], [0], [0], [1], [0, 0, 1, 1], [], []>} : vector<8x128xbf16>, vector<128x1024xbf16>, vector<8x1024xf32> -> vector<8x1024xf32>
    %94 = arith.mulf %93, %93 : vector<8x1024xf32>
    %cst_32 = arith.constant dense<0.000000e+00> : vector<8xf32>
    %95 = vector.multi_reduction <add>, %94, %cst_32 [1] : vector<8x1024xf32> to vector<8xf32>
    %96 = vector.shape_cast %95 : vector<8xf32> to vector<8x1xf32>
    %cst_33 = arith.constant 9.99999996E-13 : f32
    %97 = vector.broadcast %cst_33 : f32 to vector<8x1xf32>
    %98 = arith.addf %96, %97 : vector<8x1xf32>
    %99 = math.rsqrt %98 : vector<8x1xf32>
    %100 = vector.broadcast %99 : vector<8x1xf32> to vector<8x1024xf32>
    %101 = arith.mulf %93, %100 : vector<8x1024xf32>
    %cst_34 = arith.constant 1.000000e+00 : f32
    %102 = vector.broadcast %cst_34 : f32 to vector<8x1024xf32>
    %103 = arith.mulf %102, %101 : vector<8x1024xf32>
    %104 = arith.addf %0, %103 : vector<8x1024xf32>
    %c0_35 = arith.constant 0 : index
    %c0_36 = arith.constant 0 : index
    %105 = vector.load %arg9[%c0_35, %c0_36] : memref<8x1024xf32, #tpu.memory_space<vmem>>, vector<8x1024xf32>
    tpu.vector_store %arg9[%c0_35, %c0_36], %104 {strides = array<i32>} : memref<8x1024xf32, #tpu.memory_space<vmem>>, vector<8x1024xf32>,
    return
  }
  func.func @transform_0(%arg0: i32, %arg1: memref<1xi32, #tpu.memory_space<smem>>) -> (i32, i32) {
    %c0_i32 = arith.constant 0 : i32
    %c0_i32_0 = arith.constant 0 : i32
    return %arg0, %c0_i32 : i32, i32
  }
  func.func @transform_1(%arg0: i32, %arg1: memref<1xi32, #tpu.memory_space<smem>>) -> (i32, i32) {
    %c0_i32 = arith.constant 0 : i32
    %c0_i32_0 = arith.constant 0 : i32
    %c0_i32_1 = arith.constant 0 : i32
    return %c0_i32, %c0_i32_0 : i32, i32
  }
  func.func @transform_2(%arg0: i32, %arg1: memref<1xi32, #tpu.memory_space<smem>>) -> (i32, i32) {
    %c0_i32 = arith.constant 0 : i32
    %c0_i32_0 = arith.constant 0 : i32
    %c0_i32_1 = arith.constant 0 : i32
    return %c0_i32, %c0_i32_0 : i32, i32
  }
  func.func @transform_3(%arg0: i32, %arg1: memref<1xi32, #tpu.memory_space<smem>>) -> (i32, i32) {
    %c0_i32 = arith.constant 0 : i32
    %c0_i32_0 = arith.constant 0 : i32
    %c0_i32_1 = arith.constant 0 : i32
    return %c0_i32, %c0_i32_0 : i32, i32
  }
  func.func @transform_4(%arg0: i32, %arg1: memref<1xi32, #tpu.memory_space<smem>>) -> (i32, i32) {
    %c0_i32 = arith.constant 0 : i32
    %c0_i32_0 = arith.constant 0 : i32
    %c0_i32_1 = arith.constant 0 : i32
    return %c0_i32, %c0_i32_0 : i32, i32
  }
  func.func @transform_5(%arg0: i32, %arg1: memref<1xi32, #tpu.memory_space<smem>>) -> (i32, i32) {
    %c0_i32 = arith.constant 0 : i32
    %c0_i32_0 = arith.constant 0 : i32
    %c0_i32_1 = arith.constant 0 : i32
    return %c0_i32, %c0_i32_0 : i32, i32
  }
  func.func @transform_6(%arg0: i32, %arg1: memref<1xi32, #tpu.memory_space<smem>>) -> (i32, i32) {
    %c0_i32 = arith.constant 0 : i32
    %c0_i32_0 = arith.constant 0 : i32
    %c0_i32_1 = arith.constant 0 : i32
    return %c0_i32, %c0_i32_0 : i32, i32
  }
  func.func @transform_7(%arg0: i32, %arg1: memref<1xi32, #tpu.memory_space<smem>>) -> (i32, i32) {
    %c0_i32 = arith.constant 0 : i32
    %c0_i32_0 = arith.constant 0 : i32
    return %arg0, %c0_i32 : i32, i32
  }
}

</mosaic_0001>

<bundles_post_ra>
// kernel: tpu_custom_call.1
= control target key start
LH: loop header
LB: loop body
LE: loop exit
PB: predicated region body
PF: predicated region fallthrough
CT: control target
= control target key end

     0   :  { %14 = vsyncpa [#allocation5], 0  ;;  %s3319_s0 = inlined_call_operand.<no memory space> [shape: s32[1], index: 0, kind: input, shape index: {}]   ;;  %s3320_s1 = inlined_call_operand.hbm [shape: f32[8,1024], index: 1, kind: input, shape index: {}]   ;;  %s3321_s2 = inlined_call_operand.hbm [shape: bf16[1024,128], index: 2, kind: input, shape index: {}]   ;;  %s3322_s3 = inlined_call_operand.vmem [shape: f32[1,128], index: 3, kind: input, shape index: {}]   ;;  %s3323_s4 = inlined_call_operand.hbm [shape: bf16[128,128], index: 4, kind: input, shape index: {}]   ;;  %s3324_s5 = inlined_call_operand.vmem [shape: f32[1,128], index: 5, kind: input, shape index: {}]   ;;  %s3325_s6 = inlined_call_operand.hbm [shape: bf16[128,1024], index: 6, kind: input, shape index: {}]   ;;  %s3326_s7 = inlined_call_operand.hbm [shape: bf16[128,128], index: 7, kind: input, shape index: {}]   ;;  %s3327_s8 = inlined_call_operand.hbm [shape: f32[8,1024], index: 8, kind: output, shape index: {}]  }
   0x1   :  { %15 = vsyncpa [#allocation8], 0 }
   0x2   :  { %16 = vsyncpa [#allocation11], 0 }
   0x3   :  { %17 = vsyncpa [#allocation6], 0  ;;  %s2701_s27 = smov [#allocation7]   ;;  %s2561_s9 = scalar_lea.hbm %s3321_s2, 8192 }
   0x4   :  { %s33_s28 = sshll.u32 %s2701_s27, 4  ;;  %p2562_p0 = scmp.ne.s32.totalorder %s3321_s2, %s2561_s9  ;;  %s34_s28 = int_to_ptr.vmem [resolvable:$true] %s33_s28 }
   0x5   :  { %p2565_p1 = scmp.lt.u32.totalorder %s2561_s9, %s3321_s2 }
   0x7   :  { %p2567_p2 = pnand %p2565_p1, %p2562_p0 }
   0x9   :  { %2570 = shalt.err (!%p2567_p2)
}
   0xa   :  { %s2571_s14 = scalar_lea.vmem %s34_s28, 8192  ;;  %p2576_p4 = scmp.lt.s32.totalorder %s34_s28, %s34_s28 }
   0xb   :  { %p2572_p3 = scmp.ne.s32.totalorder %s34_s28, %s2571_s14  ;;  %p2577_p5 = scmp.lt.s32.totalorder %s2571_s14, %s2571_s14 }
   0xd   :  { %p2578_p6 = por %p2577_p5, %p2576_p4 }
   0xf   :  { %p2579_p7 = pnand %p2578_p6, %p2572_p3 }
  0x11   :  { %2582 = shalt.err (!%p2579_p7)
}
  0x12   :  { %s2702_s15 = smov 64   ;;  %s2703_s16 = smov 4  }
  0x13   :  { %39 = dma.hbm_to_vmem [thread:$0]  %s3321_s2, 8192, %s34_s28, [#allocation8], %s2702_s15, %s2702_s15, %s2703_s16  }
  0x14   :  { %s2704_s19 = smov [#allocation10]   ;;  %s2583_s23 = scalar_lea.hbm %s3325_s6, 8192 }
  0x15   :  { %s61_s20 = sshll.u32 %s2704_s19, 4  ;;  %p2584_p8 = scmp.ne.s32.totalorder %s3325_s6, %s2583_s23  ;;  %s62_s20 = int_to_ptr.vmem [resolvable:$true] %s61_s20 }
  0x16   :  { %p2587_p9 = scmp.lt.u32.totalorder %s2583_s23, %s3325_s6 }
  0x18   :  { %p2589_p10 = pnand %p2587_p9, %p2584_p8 }
  0x1a   :  { %2592 = shalt.err (!%p2589_p10)
}
  0x1b   :  { %s2593_s29 = scalar_lea.vmem %s62_s20, 8192  ;;  %p2598_p12 = scmp.lt.s32.totalorder %s62_s20, %s62_s20 }
  0x1c   :  { %p2594_p11 = scmp.ne.s32.totalorder %s62_s20, %s2593_s29  ;;  %p2599_p13 = scmp.lt.s32.totalorder %s2593_s29, %s2593_s29 }
  0x1e   :  { %p2600_p0 = por %p2599_p13, %p2598_p12 }
  0x20   :  { %p2601_p1 = pnand %p2600_p0, %p2594_p11 }
  0x22   :  { %2604 = shalt.err (!%p2601_p1)
}
  0x23   :  { %s2705_s2 = smov 512   ;;  %s2706_s28 = smov 32  }
  0x24   :  { %67 = dma.hbm_to_vmem [thread:$0]  %s3325_s6, 8192, %s62_s20, [#allocation11], %s2705_s2, %s2705_s2, %s2706_s28  }
  0x25   :  { %s2707_s10 = smov [#allocation4]   ;;  %s2708_s12 = smov [#allocation9]  }
  0x26   :  { %s24_s11 = sshll.u32 %s2707_s10, 4  ;;  %s47_s13 = sshll.u32 %s2708_s12, 4  ;;  %s25_s11 = int_to_ptr.vmem [resolvable:$true] %s24_s11  ;;  %s2786_s13 = int_to_ptr.vmem [resolvable:$true] %s47_s13 }
  0x27   :  { %s2605_s18 = scalar_lea.hbm %s3320_s1, 1024 }
  0x28   :  { %p2606_p2 = scmp.ne.s32.totalorder %s3320_s1, %s2605_s18  ;;  %p2609_p3 = scmp.lt.u32.totalorder %s2605_s18, %s3320_s1 }
  0x2a   :  { %p2611_p4 = pnand %p2609_p3, %p2606_p2 }
  0x2c   :  { %2614 = shalt.err (!%p2611_p4)
}
  0x2d   :  { %s2615_s6 = scalar_lea.vmem %s25_s11, 1024  ;;  %p2620_p6 = scmp.lt.s32.totalorder %s25_s11, %s25_s11 }
  0x2e   :  { %p2616_p5 = scmp.ne.s32.totalorder %s25_s11, %s2615_s6  ;;  %p2621_p7 = scmp.lt.s32.totalorder %s2615_s6, %s2615_s6 }
  0x30   :  { %p2622_p8 = por %p2621_p7, %p2620_p6 }
  0x32   :  { %p2623_p9 = pnand %p2622_p8, %p2616_p5 }
  0x34   :  { %2626 = shalt.err (!%p2623_p9)
}
  0x35   :  { %27 = dma.hbm_to_vmem [thread:$0]  %s3320_s1, 1024, %s25_s11, [#allocation5]  }
  0x36   :  { %s2627_s27 = scalar_lea.hbm %s3323_s4, 1024 }
  0x37   :  { %p2628_p10 = scmp.ne.s32.totalorder %s3323_s4, %s2627_s27  ;;  %p2631_p11 = scmp.lt.u32.totalorder %s2627_s27, %s3323_s4 }
  0x39   :  { %p2633_p12 = pnand %p2631_p11, %p2628_p10 }
  0x3b   :  { %2636 = shalt.err (!%p2633_p12)
}
  0x3c   :  { %s2637_s9 = scalar_lea.vmem %s2786_s13, 1024  ;;  %p2642_p0 = scmp.lt.s32.totalorder %s2786_s13, %s2786_s13 }
  0x3d   :  { %p2638_p13 = scmp.ne.s32.totalorder %s2786_s13, %s2637_s9  ;;  %p2643_p1 = scmp.lt.s32.totalorder %s2637_s9, %s2637_s9 }
  0x3f   :  { %p2644_p2 = por %p2643_p1, %p2642_p0 }
  0x41   :  { %p2645_p3 = pnand %p2644_p2, %p2638_p13 }
  0x43   :  { %2648 = shalt.err (!%p2645_p3)
}
  0x44   :  { %53 = dma.hbm_to_vmem [thread:$0]  %s3323_s4, 1024, %s2786_s13, [#allocation8], %s2702_s15, %s2702_s15, %s2703_s16  }
  0x45   :  { %s2709_s11 = smov [#allocation12]   ;;  %s2649_s18 = scalar_lea.hbm %s3326_s7, 1024 }
  0x46   :  { %s73_s12 = sshll.u32 %s2709_s11, 4  ;;  %p2650_p4 = scmp.ne.s32.totalorder %s3326_s7, %s2649_s18  ;;  %s74_s12 = int_to_ptr.vmem [resolvable:$true] %s73_s12 }
  0x47   :  { %p2653_p5 = scmp.lt.u32.totalorder %s2649_s18, %s3326_s7 }
  0x49   :  { %p2655_p6 = pnand %p2653_p5, %p2650_p4 }
  0x4b   :  { %2658 = shalt.err (!%p2655_p6)
}
  0x4c   :  { %s2659_s6 = scalar_lea.vmem %s74_s12, 1024  ;;  %p2664_p8 = scmp.lt.s32.totalorder %s74_s12, %s74_s12 }
  0x4d   :  { %p2660_p7 = scmp.ne.s32.totalorder %s74_s12, %s2659_s6  ;;  %p2665_p9 = scmp.lt.s32.totalorder %s2659_s6, %s2659_s6 }
  0x4f   :  { %p2666_p10 = por %p2665_p9, %p2664_p8 }
  0x51   :  { %p2667_p11 = pnand %p2666_p10, %p2660_p7 }
  0x53   :  { %2670 = shalt.err (!%p2667_p11)
}
  0x54   :  { %79 = dma.hbm_to_vmem [thread:$0]  %s3326_s7, 1024, %s74_s12, [#allocation11], %s2702_s15, %s2702_s15, %s2703_s16  }
  0x55   :  { %2693 = dma.done.wait [#allocation5], 1024  }
  0x56   :  { %2694 = vsyncadd [#allocation5], 4294966272 }
  0x57   :  { %2695 = dma.done.wait [#allocation8], 9216  }
  0x58   :  { %2696 = vsyncadd [#allocation8], 4294958080 }
  0x59   :  { %2697 = dma.done.wait [#allocation11], 9216  }
  0x5a   :  { %2698 = vsyncadd [#allocation11], 4294958080  ;;  %v2835_v0 = vld [vmem:[#allocation7 + $0x40] sm:$0xff]   ;;  %v2844_v4 = vld [vmem:[#allocation7 + $0x48] sm:$0xff]   ;;  %v330_v5 = vlaneseq  ;;  %v2878_v23 = vstv %s3319_s0  ;;  %vm2711_vm0 = vmmov 0  }
  0x5b   :  { %v2837_v1 = vld [vmem:[#allocation7 + $0xc0] sm:$0xff]   ;;  %2179 = vmatprep.subr.bf16.mxu0 %v2835_v0  ;;  %v2460_v6 = vld [vmem:[#allocation7 + $0xc8] sm:$0xff]   ;;  %v2850_v9 = vld [vmem:[#allocation7 + $0x50] sm:$0xff]  }
  0x5c   :  { %v2840_v2 = vld [vmem:[#allocation7] sm:$0xff]   ;;  %2201 = vmatprep.subr.bf16.mxu1 %v2837_v1  ;;  %v2847_v7 = vld [vmem:[#allocation7 + $0x8] sm:$0xff]   ;;  %v331_v10 = vshrl.u32 %v330_v5, 7  ;;  %v2464_v11 = vld [vmem:[#allocation7 + $0xd0] sm:$0xff]   ;;  %v2863_v18 = vand.u32 127, %v330_v5 }
  0x5d   :  { %v2458_v3 = vld [vmem:[#allocation7 + $0x80] sm:$0xff]   ;;  %2180 = vmatpush3.bf16.msra.mxu0 %v2840_v2  ;;  %v2462_v8 = vld [vmem:[#allocation7 + $0x88] sm:$0xff]   ;;  %v2853_v12 = vld [vmem:[#allocation7 + $0x10] sm:$0xff]  }
  0x5e   :  { %2202 = vmatpush3.bf16.msra.mxu1 %v2458_v3  ;;  %2181 = vmatprep.subr.bf16.mxu0 %v2844_v4  ;;  %v2466_v13 = vld [vmem:[#allocation7 + $0x90] sm:$0xff]   ;;  %v2856_v14 = vld [vmem:[#allocation7 + $0x58] sm:$0xff]   ;;  %v2858_v15 = vmul.u32 1024, %v331_v10  ;;  %v2868_v20 = vld [vmem:[#allocation7 + $0x60] sm:$0xff]   ;;  %v337_v59 = vadd.s32 128, %v2863_v18  ;;  %v338_v61 = vadd.s32 256, %v2863_v18 }
  0x5f   :  { %2203 = vmatprep.subr.bf16.mxu1 %v2460_v6  ;;  %v2468_v16 = vld [vmem:[#allocation7 + $0xd8] sm:$0xff]   ;;  %v2873_v22 = vld [vmem:[#allocation7 + $0xe0] sm:$0xff]   ;;  %v2887_v26 = vld [vmem:[#allocation7 + $0x68] sm:$0xff]   ;;  %v339_v63 = vadd.s32 384, %v2863_v18  ;;  %v340_v5 = vadd.s32 512, %v2863_v18 }
  0x60   :  { %v2861_v17 = vld [vmem:[#allocation7 + $0x18] sm:$0xff]   ;;  %v345_v21 = vadd.s32 %v2858_v15, %v2863_v18  ;;  %3361 = vst [vmem:[#allocation19_spill] sm:$0xff] %v2873_v22  ;;  %v2881_v24 = vld [vmem:[#allocation7 + $0x20] sm:$0xff]   ;;  %v2891_v28 = vld [vmem:[#allocation7 + $0xe8] sm:$0xff]   ;;  %v346_v10 = vadd.s32 %v2858_v15, %v337_v59 }
  0x61   :  { %2182 = vmatpush3.bf16.msra.mxu0 %v2847_v7  ;;  %v2865_v19 = vld [vmem:[#allocation7 + $0x98] sm:$0xff]   ;;  %v2884_v25 = vld [vmem:[#allocation7 + $0xa0] sm:$0xff]   ;;  %3363 = vst [vmem:[#allocation21_spill] sm:$0xff] %v2891_v28  ;;  %v2894_v29 = vld [vmem:[#allocation7 + $0x28] sm:$0xff]  }
  0x62   :  { %2204 = vmatpush3.bf16.msra.mxu1 %v2462_v8  ;;  %2183 = vmatprep.subr.bf16.mxu0 %v2850_v9  ;;  %3360 = vst [vmem:[#allocation18_spill] sm:$0xff] %v2865_v19  ;;  %3362 = vst [vmem:[#allocation20_spill] sm:$0xff] %v2884_v25  ;;  %v355_v27 = vadd.s32 %v2878_v23, %v345_v21  ;;  %v2897_v30 = vld [vmem:[#allocation7 + $0xa8] sm:$0xff]   ;;  %v2900_v31 = vld [vmem:[#allocation7 + $0x70] sm:$0xff]   ;;  %v341_v8 = vadd.s32 640, %v2863_v18  ;;  %v356_v59 = vadd.s32 %v2878_v23, %v346_v10 }
  0x63   :  { %2205 = vmatprep.subr.bf16.mxu1 %v2464_v11  ;;  %3364 = vst [vmem:[#allocation22_spill] sm:$0xff] %v2897_v30  ;;  %v2903_v33 = vld [vmem:[#allocation7 + $0xf0] sm:$0xff]   ;;  %v2912_v36 = vld [vmem:[#allocation7 + $0x78] sm:$0xff]   ;;  %v2926_v41 = vld [vmem:[#allocation4 + $0x8] sm:$0xff] }
  0x64   :  { %v363_v32 = vshrl.u32 %v355_v27, 16  ;;  %3365 = vst [vmem:[#allocation23_spill] sm:$0xff] %v2903_v33  ;;  %v2906_v34 = vld [vmem:[#allocation7 + $0x30] sm:$0xff]   ;;  %v2917_v38 = vld [vmem:[#allocation7 + $0xf8] sm:$0xff]   ;;  %v2930_v43 = vld [vmem:[#allocation4] sm:$0xff]  ;;  %v479_v45 = vpack.c.bf16 %v2926_v41, %v2926_v41 }
  0x65   :  { %2184 = vmatpush3.bf16.msra.mxu0 %v2853_v12  ;;  %v2909_v35 = vld [vmem:[#allocation7 + $0xb0] sm:$0xff]   ;;  %3367 = vst [vmem:[#allocation25_spill] sm:$0xff] %v2917_v38  ;;  %v2920_v39 = vld [vmem:[#allocation7 + $0x38] sm:$0xff]   ;;  %v478_v47 = vpack.c.bf16 %v2930_v43, %v2930_v43  ;;  %v2944_v50 = vld [vmem:[#allocation7 + $0x140] sm:$0xff]  }
  0x66   :  { %2206 = vmatpush3.bf16.msra.mxu1 %v2466_v13  ;;  %2185 = vmatprep.subr.bf16.mxu0 %v2856_v14  ;;  %3366 = vst [vmem:[#allocation24_spill] sm:$0xff] %v2909_v35  ;;  %v2914_v37 = vxor.u32 %v363_v32, %v355_v27  ;;  %v2923_v40 = vld [vmem:[#allocation7 + $0xb8] sm:$0xff]   ;;  %v2940_v48 = vld [vmem:[#allocation4 + $0x10] sm:$0xff]  ;;  %v2946_v51 = vld [vmem:[#allocation7 + $0x1c0] sm:$0xff]   ;;  %v342_v13 = vadd.s32 768, %v2863_v18  ;;  %v343_v27 = vadd.s32 896, %v2863_v18  ;;  %v348_v32 = vadd.s32 %v2858_v15, %v339_v63 }
  0x67   :  { %2207 = vmatprep.subr.bf16.mxu1 %v2468_v16  ;;  %3368 = vst [vmem:[#allocation26_spill] sm:$0xff] %v2923_v40  ;;  %v2928_v42 = vld [vmem:[#allocation4 + $0x18] sm:$0xff]  ;;  %3369 = vst [vmem:[#allocation27_spill] sm:$0xff] %v2940_v48  ;;  %v480_v49 = vpack.c.bf16 %v2940_v48, %v2940_v48  ;;  %908 = vmatprep.mubr.bf16.mxu0 %v479_v45  ;;  %v2948_v52 = vld [vmem:[#allocation7 + $0x100] sm:$0xff]   ;;  %v347_v16 = vadd.s32 %v2858_v15, %v338_v61 }
  0x68   :  { %v481_v46 = vpack.c.bf16 %v2928_v42, %v2928_v42  ;;  %3370 = vst [vmem:[#allocation28_spill] sm:$0xff] %v2946_v51  ;;  %v2952_v53 = vld [vmem:[#allocation7 + $0x180] sm:$0xff]   ;;  %v2955_v54 = vld [vmem:[#allocation7 + $0x148] sm:$0xff]   ;;  %v2967_v58 = vld [vmem:[#allocation7 + $0x150] sm:$0xff]   ;;  %v351_v18 = vadd.s32 %v2858_v15, %v342_v13 }
  0x69   :  { %2186 = vmatpush3.bf16.msra.mxu0 %v2861_v17  ;;  %3371 = vst [vmem:[#allocation29_spill] sm:$0xff] %v2952_v53  ;;  %v2958_v55 = vld [vmem:[#allocation7 + $0x1c8] sm:$0xff]   ;;  %v2971_v60 = vld [vmem:[#allocation7 + $0x1d0] sm:$0xff]   ;;  %v2983_v6 = vld [vmem:[#allocation7 + $0x158] sm:$0xff]   ;;  %v357_v63 = vadd.s32 %v2878_v23, %v347_v16  ;;  %v364_v16 = vshrl.u32 %v356_v59, 16 }
  0x6a   :  { %2208 = vmatpush3.bf16.msra.mxu1 %v2865_v19  ;;  %2187 = vmatprep.subr.bf16.mxu0 %v2868_v20  ;;  %3372 = vst [vmem:[#allocation30_spill] sm:$0xff] %v2958_v55  ;;  %v2961_v56 = vld [vmem:[#allocation7 + $0x108] sm:$0xff]   ;;  %3374 = vst [vmem:[#allocation32_spill] sm:$0xff] %v2971_v60  ;;  %v2975_v62 = vld [vmem:[#allocation7 + $0x110] sm:$0xff]  }
  0x6b   :  { %2209 = vmatprep.subr.bf16.mxu1 %v2873_v22  ;;  %948 = vmatprep.mubr.bf16.mxu1 %v481_v46  ;;  %v2964_v57 = vld [vmem:[#allocation7 + $0x188] sm:$0xff]   ;;  %v2979_v3 = vld [vmem:[#allocation7 + $0x190] sm:$0xff]   ;;  %v2988_v11 = vld [vmem:[#allocation7 + $0x1d8] sm:$0xff]   ;;  %v349_v46 = vadd.s32 %v2858_v15, %v340_v5  ;;  %v352_v5 = vadd.s32 %v2858_v15, %v343_v27  ;;  %v365_v27 = vshrl.u32 %v357_v63, 16 }
  0x6c   :  { %3373 = vst [vmem:[#allocation31_spill] sm:$0xff] %v2964_v57  ;;  %3375 = vst [vmem:[#allocation33_spill] sm:$0xff] %v2979_v3  ;;  %v2993_v21 = vld [vmem:[#allocation7 + $0x118] sm:$0xff]   ;;  %v3007_v61 = vld [vmem:[#allocation7 + $0x1e0] sm:$0xff]  }
  0x6d   :  { %2188 = vmatpush3.bf16.msra.mxu0 %v2881_v24  ;;  %3376 = vst [vmem:[#allocation34_spill] sm:$0xff] %v2988_v11  ;;  %v2998_v45 = vld [vmem:[#allocation7 + $0x198] sm:$0xff]   ;;  %3378 = vst [vmem:[#allocation36_spill] sm:$0xff] %v3007_v61  ;;  %v3012_v44 = vld [vmem:[#allocation7 + $0x120] sm:$0xff]   ;;  %v359_v10 = vadd.s32 %v2878_v23, %v349_v46  ;;  %v362_v46 = vadd.s32 %v2878_v23, %v352_v5 }
  0x6e   :  { %2210 = vmatpush3.bf16.msra.mxu1 %v2884_v25  ;;  %2189 = vmatprep.subr.bf16.mxu0 %v2887_v26  ;;  %3377 = vst [vmem:[#allocation35_spill] sm:$0xff] %v2998_v45  ;;  %v3045_v5 = vld [vmem:[#allocation7 + $0x1b0] sm:$0xff]   ;;  %v3050_v48 = vld [vmem:[#allocation7 + $0x178] sm:$0xff]  }
  0x6f   :  { %2211 = vmatprep.subr.bf16.mxu1 %v2891_v28  ;;  %3384 = vst [vmem:[#allocation42_spill] sm:$0xff] %v3045_v5  ;;  %3386 = vst [vmem:[#allocation43_spill] sm:$0xff] %v3050_v48  ;;  %v3061_v28 = vld [vmem:[#allocation4 + $0x28] sm:$0xff] }
  0x71   :  { %2190 = vmatpush3.bf16.msra.mxu0 %v2894_v29 }
  0x72   :  { %2212 = vmatpush3.bf16.msra.mxu1 %v2897_v30  ;;  %2191 = vmatprep.subr.bf16.mxu0 %v2900_v31 }
  0x73   :  { %2213 = vmatprep.subr.bf16.mxu1 %v2903_v33 }
  0x75   :  { %2192 = vmatpush3.bf16.msra.mxu0 %v2906_v34 }
  0x76   :  { %2214 = vmatpush3.bf16.msra.mxu1 %v2909_v35  ;;  %2193 = vmatprep.subr.bf16.mxu0 %v2912_v36  ;;  %v3053_v35 = vld [vmem:[#allocation7 + $0x1f8] sm:$0xff]  }
  0x77   :  { %2215 = vmatprep.subr.bf16.mxu1 %v2917_v38  ;;  %3387 = vst [vmem:[#allocation44_spill] sm:$0xff] %v3053_v35 }
  0x79   :  { %2194 = vmatpush3.bf16.msra.mxu0 %v2920_v39 }
  0x7a   :  { %2216 = vmatpush3.bf16.msra.mxu1 %v2923_v40  ;;  %2223 = vmatprep.subr.bf16.mxu0 %v2944_v50 }
  0x7b   :  { %2245 = vmatprep.subr.bf16.mxu1 %v2946_v51  ;;  %v3385_v51 = vmul.u32 2246822507, %v2914_v37 }
  0x7c   :  { %909 = vmatmul.mubr.bf16.vlgmr.msra.gmra.mrb[0].mxu0 %v478_v47  ;;  %v3002_v47 = vld [vmem:[#allocation7 + $0x160] sm:$0xff]  }
  0x7d   :  { %949 = vmatmul.mubr.bf16.vlgmr.msra.gmra.mrb[0].mxu1 %v480_v49  ;;  %2224 = vmatpush3.bf16.msra.mxu0 %v2948_v52  ;;  %v350_v49 = vadd.s32 %v2858_v15, %v341_v8  ;;  %v3017_v8 = vld [vmem:[#allocation7 + $0x1a0] sm:$0xff]   ;;  %v361_v15 = vadd.s32 %v2878_v23, %v351_v18  ;;  %v3039_v18 = vld [vmem:[#allocation7 + $0x1f0] sm:$0xff]   ;;  %v387_v40 = vshrl.u32 %v3385_v51, 13  ;;  %v3059_v51 = vld [vmem:[#allocation7 + $0x1b8] sm:$0xff]  }
  0x7e   :  { %2246 = vmatpush3.bf16.msra.mxu1 %v2952_v53  ;;  %2225 = vmatprep.subr.bf16.mxu0 %v2955_v54  ;;  %3379 = vst [vmem:[#allocation37_spill] sm:$0xff] %v3017_v8  ;;  %3382 = vst [vmem:[#allocation40_spill] sm:$0xff] %v3039_v18  ;;  %v3042_v53 = vld [vmem:[#allocation7 + $0x130] sm:$0xff]  }
  0x7f   :  { %2247 = vmatprep.subr.bf16.mxu1 %v2958_v55  ;;  %v360_v13 = vadd.s32 %v2878_v23, %v350_v49  ;;  %v367_v49 = vshrl.u32 %v359_v10, 16  ;;  %v369_v55 = vshrl.u32 %v361_v15, 16  ;;  %3383 = vst [vmem:[#allocation41_spill] sm:$0xff] %v3042_v53  ;;  %3389 = vst [vmem:[#allocation46_spill] sm:$0xff] %v3059_v51 }
  0x81   :  { %2226 = vmatpush3.bf16.msra.mxu0 %v2961_v56  ;;  %v375_v33 = vxor.u32 %v367_v49, %v359_v10  ;;  %v3072_v10 = vld [vmem:[#allocation4 + $0x20] sm:$0xff] }
  0x82   :  { %2248 = vmatpush3.bf16.msra.mxu1 %v2964_v57  ;;  %2227 = vmatprep.subr.bf16.mxu0 %v2967_v58  ;;  %v368_v57 = vshrl.u32 %v360_v13, 16  ;;  %3392 = vst [vmem:[#allocation48_spill] sm:$0xff] %v3072_v10 }
  0x83   :  { %2249 = vmatprep.subr.bf16.mxu1 %v2971_v60  ;;  %v3033_v60 = vld [vmem:[#allocation7 + $0x1a8] sm:$0xff]  }
  0x84   :  { %3381 = vst [vmem:[#allocation39_spill] sm:$0xff] %v3033_v60  ;;  %v376_v30 = vxor.u32 %v368_v57, %v360_v13  ;;  %v483_v57 = vpack.c.bf16 %v3061_v28, %v3061_v28  ;;  %v3074_v13 = vld [vmem:[#allocation4 + $0x30] sm:$0xff] }
  0x85   :  { %2228 = vmatpush3.bf16.msra.mxu0 %v2975_v62  ;;  %3393 = vst [vmem:[#allocation49_spill] sm:$0xff] %v3074_v13 }
  0x86   :  { %2250 = vmatpush3.bf16.msra.mxu1 %v2979_v3  ;;  %2229 = vmatprep.subr.bf16.mxu0 %v2983_v6  ;;  %v3025_v3 = vld [vmem:[#allocation7 + $0x1e8] sm:$0xff]   ;;  %v384_v49 = vmul.u32 2246822507, %v376_v30 }
  0x87   :  { %2251 = vmatprep.subr.bf16.mxu1 %v2988_v11  ;;  %v358_v11 = vadd.s32 %v2878_v23, %v348_v32  ;;  %3380 = vst [vmem:[#allocation38_spill] sm:$0xff] %v3025_v3  ;;  %v3029_v32 = vld [vmem:[#allocation7 + $0x128] sm:$0xff]   ;;  %v370_v23 = vshrl.u32 %v362_v46, 16  ;;  %988 = vmatprep.mubr.bf16.mxu0 %v483_v57 }
  0x89   :  { %2230 = vmatpush3.bf16.msra.mxu0 %v2993_v21 }
  0x8a   :  { %2252 = vmatpush3.bf16.msra.mxu1 %v2998_v45  ;;  %2231 = vmatprep.subr.bf16.mxu0 %v3002_v47  ;;  %v3021_v45 = vld [vmem:[#allocation7 + $0x168] sm:$0xff]  }
  0x8b   :  { %2253 = vmatprep.subr.bf16.mxu1 %v3007_v61  ;;  %v366_v61 = vshrl.u32 %v358_v11, 16 }
  0x8d   :  { %2232 = vmatpush3.bf16.msra.mxu0 %v3012_v44  ;;  %v374_v38 = vxor.u32 %v366_v61, %v358_v11  ;;  %v3391_v61 = vmul.u32 2246822507, %v2914_v37  ;;  %v482_v37 = vpack.c.bf16 %v3072_v10, %v3072_v10 }
  0x8e   :  { %2254 = vmatpush3.bf16.msra.mxu1 %v3017_v8  ;;  %2233 = vmatprep.subr.bf16.mxu0 %v3021_v45  ;;  %v3036_v8 = vld [vmem:[#allocation7 + $0x170] sm:$0xff]  }
  0x8f   :  { %2255 = vmatprep.subr.bf16.mxu1 %v3025_v3  ;;  %v372_v3 = vxor.u32 %v364_v16, %v356_v59  ;;  %v377_v59 = vxor.u32 %v369_v55, %v361_v15  ;;  %v378_v16 = vxor.u32 %v370_v23, %v362_v46  ;;  %v382_v46 = vmul.u32 2246822507, %v374_v38 }
  0x90   :  { %v392_v38 = vshrl.u32 %v384_v49, 13 }
  0x91   :  { %2234 = vmatpush3.bf16.msra.mxu0 %v3029_v32  ;;  %v380_v11 = vmul.u32 2246822507, %v372_v3  ;;  %v383_v3 = vmul.u32 2246822507, %v375_v33 }
  0x92   :  { %2256 = vmatpush3.bf16.msra.mxu1 %v3033_v60  ;;  %2235 = vmatprep.subr.bf16.mxu0 %v3036_v8  ;;  %v373_v60 = vxor.u32 %v365_v27, %v357_v63  ;;  %v3063_v63 = vld [vmem:[#allocation4 + $0x38] sm:$0xff]  ;;  %v395_v27 = vxor.u32 %v387_v40, %v3391_v61  ;;  %v484_v40 = vpack.c.bf16 %v3074_v13, %v3074_v13  ;;  %v385_v23 = vmul.u32 2246822507, %v377_v59 }
  0x93   :  { %2257 = vmatprep.subr.bf16.mxu1 %v3039_v18  ;;  %v3056_v18 = vld [vmem:[#allocation7 + $0x138] sm:$0xff]   ;;  %3390 = vst [vmem:[#allocation47_spill] sm:$0xff] %v3063_v63  ;;  %v485_v55 = vpack.c.bf16 %v3063_v63, %v3063_v63  ;;  %v386_v61 = vmul.u32 2246822507, %v378_v16  ;;  %v390_v63 = vshrl.u32 %v382_v46, 13  ;;  %v400_v57 = vxor.u32 %v392_v38, %v384_v49 }
  0x94   :  { %3388 = vst [vmem:[#allocation45_spill] sm:$0xff] %v3056_v18  ;;  %v381_v15 = vmul.u32 2246822507, %v373_v60  ;;  %v391_v60 = vshrl.u32 %v383_v3, 13  ;;  %v403_v25 = vmul.u32 3266489909, %v395_v27 }
  0x95   :  { %2236 = vmatpush3.bf16.msra.mxu0 %v3042_v53  ;;  %1028 = vmatprep.mubr.bf16.mxu1 %v485_v55  ;;  %v394_v22 = vshrl.u32 %v386_v61, 13  ;;  %v398_v33 = vxor.u32 %v390_v63, %v382_v46 }
  0x96   :  { %2258 = vmatpush3.bf16.msra.mxu1 %v3045_v5  ;;  %2237 = vmatprep.subr.bf16.mxu0 %v3050_v48  ;;  %v389_v5 = vshrl.u32 %v381_v15, 13  ;;  %v399_v30 = vxor.u32 %v391_v60, %v383_v3  ;;  %v411_v55 = vshrl.u32 %v403_v25, 16 }
  0x97   :  { %2259 = vmatprep.subr.bf16.mxu1 %v3053_v35  ;;  %v388_v35 = vshrl.u32 %v380_v11, 13  ;;  %v402_v16 = vxor.u32 %v394_v22, %v386_v61  ;;  %v406_v27 = vmul.u32 3266489909, %v398_v33 }
  0x98   :  { %v397_v13 = vxor.u32 %v389_v5, %v381_v15  ;;  %v407_v48 = vmul.u32 3266489909, %v399_v30 }
  0x99   :  { %2238 = vmatpush3.bf16.msra.mxu0 %v3056_v18  ;;  %v396_v19 = vxor.u32 %v388_v35, %v380_v11  ;;  %v410_v5 = vmul.u32 3266489909, %v402_v16  ;;  %v414_v63 = vshrl.u32 %v406_v27, 16 }
  0x9a   :  { %2260 = vmatpush3.bf16.msra.mxu1 %v3059_v51  ;;  %v393_v51 = vshrl.u32 %v385_v23, 13  ;;  %v405_v18 = vmul.u32 3266489909, %v397_v13  ;;  %v415_v11 = vshrl.u32 %v407_v48, 16 }
  0x9b   :  { %2276 = vmatprep.subr.bf16.mxu1 %v2835_v0  ;;  %v419_v0 = vxor.u32 %v411_v55, %v403_v25  ;;  %v422_v13 = vxor.u32 %v414_v63, %v406_v27 }
  0x9c   :  { %989 = vmatmul.mubr.bf16.vlgmr.msra.gmra.mrb[4].mxu0 %v482_v37  ;;  %v401_v59 = vxor.u32 %v393_v51, %v385_v23  ;;  %v404_v37 = vmul.u32 3266489909, %v396_v19  ;;  %v413_v35 = vshrl.u32 %v405_v18, 16  ;;  %v423_v46 = vxor.u32 %v415_v11, %v407_v48 }
  0x9d   :  { %1029 = vmatmul.mubr.bf16.vlgmr.msra.gmra.mrb[4].mxu1 %v484_v40  ;;  %v408_v40 = vmul.u32 3266489909, %v400_v57  ;;  %v427_v15 = vand.u32 2147483647, %v419_v0  ;;  %v430_v38 = vand.u32 2147483647, %v422_v13 }
  0x9e   :  { %2277 = vmatpush3.bf16.msra.mxu1 %v2840_v2  ;;  %v409_v53 = vmul.u32 3266489909, %v401_v59  ;;  %v412_v10 = vshrl.u32 %v404_v37, 16  ;;  %v421_v19 = vxor.u32 %v413_v35, %v405_v18  ;;  %v431_v33 = vand.u32 2147483647, %v423_v46 }
  0x9f   :  { %2278 = vmatprep.subr.bf16.mxu1 %v2844_v4  ;;  %v416_v2 = vshrl.u32 %v408_v40, 16  ;;  %v418_v4 = vshrl.u32 %v410_v5, 16  ;;  %v435_v25 = vcvt.s32.f32 %v427_v15  ;;  %v438_v48 = vcvt.s32.f32 %v430_v38 }
  0xa0   :  { %v417_v51 = vshrl.u32 %v409_v53, 16  ;;  %v420_v22 = vxor.u32 %v412_v10, %v404_v37  ;;  %v429_v61 = vand.u32 2147483647, %v421_v19  ;;  %v439_v55 = vcvt.s32.f32 %v431_v33  ;;  %v3168_v33 = vld [vmem:[%s3322_s3] ss:$0 sm:$0xff] }
  0xa1   :  { %v424_v3 = vxor.u32 %v416_v2, %v408_v40  ;;  %v426_v60 = vxor.u32 %v418_v4, %v410_v5  ;;  %v3086_v30 = vadd.f32 -1.0737418e+09, %v435_v25  ;;  %v3096_v0 = vadd.f32 -1.0737418e+09, %v438_v48 }
  0xa2   :  { %2279 = vmatpush3.bf16.msra.mxu1 %v2847_v7  ;;  %v425_v49 = vxor.u32 %v417_v51, %v409_v53  ;;  %v428_v23 = vand.u32 2147483647, %v420_v22  ;;  %v437_v57 = vcvt.s32.f32 %v429_v61  ;;  %v2710_v25 = vmov 0.0  }
  0xa3   :  { %2280 = vmatprep.subr.bf16.mxu1 %v2850_v9  ;;  %v432_v7 = vand.u32 2147483647, %v424_v3  ;;  %v434_v9 = vand.u32 2147483647, %v426_v60  ;;  %v451_v53 = vmul.f32 %v3086_v30, %v3086_v30  ;;  %v454_v11 = vmul.f32 %v3096_v0, %v3096_v0  ;;  %2382 = vmatprep.subr.bf16.mxu0 %v2710_v25  ;;  %v3155_v3 = vld [vmem:[#allocation9 + $0x30] sm:$0xff]  }
  0xa4   :  { %v433_v10 = vand.u32 2147483647, %v425_v49  ;;  %v436_v18 = vcvt.s32.f32 %v428_v23  ;;  %v3094_v27 = vadd.f32 -1.0737418e+09, %v437_v57  ;;  %v3159_v49 = vld [vmem:[#allocation9 + $0x38] sm:$0xff]   ;;  %2398 = vmatprep.mubr.msk.bf16.mxu0 %vm2711_vm0, %v2710_v25 }
  0xa5   :  { %v440_v59 = vcvt.s32.f32 %v432_v7  ;;  %v442_v63 = vcvt.s32.f32 %v434_v9 }
  0xa6   :  { %2281 = vmatpush3.bf16.msra.mxu1 %v2853_v12  ;;  %v441_v16 = vcvt.s32.f32 %v433_v10  ;;  %v3092_v37 = vadd.f32 -1.0737418e+09, %v436_v18  ;;  %v3099_v12 = vadd.f32 -1.0737418e+09, %v439_v55  ;;  %v453_v40 = vmul.f32 %v3094_v27, %v3094_v27 }
  0xa7   :  { %2282 = vmatprep.subr.bf16.mxu1 %v2856_v14  ;;  %v3106_v35 = vadd.f32 -1.0737418e+09, %v440_v59  ;;  %v3116_v51 = vadd.f32 -1.0737418e+09, %v442_v63 }
  0xa8   :  { %v452_v14 = vmul.f32 %v3092_v37, %v3092_v37  ;;  %v3108_v5 = vadd.f32 -1.0737418e+09, %v441_v16 }
  0xaa   :  { %2283 = vmatpush3.bf16.msra.mxu1 %v2861_v17  ;;  %v459_v15 = vadd.f32 %v452_v14, %v451_v53  ;;  %v455_v17 = vmul.f32 %v3099_v12, %v3099_v12  ;;  %v457_v19 = vmul.f32 %v3108_v5, %v3108_v5 }
  0xab   :  { %2284 = vmatprep.subr.bf16.mxu1 %v2868_v20  ;;  %v456_v20 = vmul.f32 %v3106_v35, %v3106_v35 }
  0xac   :  { %v460_v2 = vadd.f32 %v459_v15, %v453_v40 }
  0xae   :  { %2285 = vmatpush3.bf16.msra.mxu1 %v2881_v24  ;;  %v461_v22 = vadd.f32 %v460_v2, %v454_v11  ;;  %v458_v24 = vmul.f32 %v3116_v51, %v3116_v51 }
  0xaf   :  { %2286 = vmatprep.subr.bf16.mxu1 %v2887_v26 }
  0xb0   :  { %v462_v4 = vadd.f32 %v461_v22, %v455_v17 }
  0xb2   :  { %2287 = vmatpush3.bf16.msra.mxu1 %v2894_v29  ;;  %v463_v13 = vadd.f32 %v462_v4, %v456_v20  ;;  %v3130_v29 = vld [vmem:[#allocation9] sm:$0xff]  }
  0xb3   :  { %2288 = vmatprep.subr.bf16.mxu1 %v2900_v31  ;;  %2383 = vmatpush3.bf16.msra.mxu0 %v3130_v29  ;;  %v3134_v31 = vld [vmem:[#allocation9 + $0x8] sm:$0xff]  }
  0xb4   :  { %v464_v26 = vadd.f32 %v463_v13, %v457_v19  ;;  %2384 = vmatprep.subr.bf16.mxu0 %v2710_v25 }
  0xb6   :  { %2289 = vmatpush3.bf16.msra.mxu1 %v2906_v34  ;;  %v465_v46 = vadd.f32 %v464_v26, %v458_v24  ;;  %v3138_v34 = vld [vmem:[#allocation9 + $0x10] sm:$0xff]  }
  0xb7   :  { %2290 = vmatprep.subr.bf16.mxu1 %v2912_v36  ;;  %2385 = vmatpush3.bf16.msra.mxu0 %v3134_v31  ;;  %v3142_v36 = vld [vmem:[#allocation9 + $0x18] sm:$0xff]   ;;  %v3394_v26 = vld [vmem:[#allocation48_spill] sm:$0xff] }
  0xb8   :  { %466 = vadd.xlane.f32.xlu0 %v465_v46  ;;  %2386 = vmatprep.subr.bf16.mxu0 %v2710_v25 }
  0xba   :  { %2291 = vmatpush3.bf16.msra.mxu1 %v2920_v39  ;;  %v3146_v39 = vld [vmem:[#allocation9 + $0x20] sm:$0xff]  }
  0xbb   :  { %2320 = vmatprep.subr.bf16.mxu1 %v2944_v50  ;;  %2387 = vmatpush3.bf16.msra.mxu0 %v3138_v34  ;;  %v3151_v50 = vld [vmem:[#allocation9 + $0x28] sm:$0xff]  }
  0xbc   :  { %2388 = vmatprep.subr.bf16.mxu0 %v2710_v25 }
  0xbf   :  { %2389 = vmatpush3.bf16.msra.mxu0 %v3142_v36 }
  0xc0   :  { %2390 = vmatprep.subr.bf16.mxu0 %v2710_v25 }
  0xc3   :  { %2391 = vmatpush3.bf16.msra.mxu0 %v3146_v39 }
  0xc4   :  { %2392 = vmatprep.subr.bf16.mxu0 %v2710_v25 }
  0xc7   :  { %2393 = vmatpush3.bf16.msra.mxu0 %v3151_v50 }
  0xc8   :  { %2394 = vmatprep.subr.bf16.mxu0 %v2710_v25 }
  0xcb   :  { %2395 = vmatpush3.bf16.msra.mxu0 %v3155_v3 }
  0xcc   :  { %2396 = vmatprep.subr.bf16.mxu0 %v2710_v25 }
  0xcf   :  { %2397 = vmatpush3.bf16.msra.mxu0 %v3159_v49 }
  0xd0   :  { %2298 = vmatprep.subr.bf16.mxu0 %v2837_v1 }
 0x145   :  { %v467_v23 = vpop.xlane.xlu0 %466 }
 0x146   :  { %v468_v61 = vadd.f32 1e-12, %v467_v23  ;;  %v3395_v23 = vld [vmem:[#allocation41_spill] sm:$0xff] }
 0x148   :  { %2535 = vrsqrt.f32 %v468_v61  ;;  %v3396_v61 = vld [vmem:[#allocation43_spill] sm:$0xff] }
 0x14f   :  { %v2195_v60 = vpop.f32.mrb[0].mxu0 }
 0x150   :  { %v2217_v38 = vpop.f32.mrb[0].mxu1  ;;  %v2196_v7 = vpop.f32.mrb[1].mxu0 }
 0x151   :  { %v2218_v10 = vpop.f32.mrb[1].mxu1  ;;  %v2197_v18 = vadd.f32 %v2196_v7, %v2195_v60  ;;  %v2198_v9 = vpop.f32.mrb[2].mxu0  ;;  %v2547_v7 = vld [vmem:[#allocation7 + $0x80] sm:$0xff]  }
 0x152   :  { %v2219_v57 = vadd.f32 %v2218_v10, %v2217_v38  ;;  %v2220_v1 = vpop.f32.mrb[2].mxu1  ;;  %v2199_v48 = vpop.f32.mrb[3].mxu0  ;;  %v3397_v10 = vld [vmem:[#allocation45_spill] sm:$0xff]  ;;  %v3398_v9 = vld [vmem:[#allocation18_spill] sm:$0xff] }
 0x153   :  { %v2221_v55 = vpop.f32.mrb[3].mxu1  ;;  %v911_v53 = vadd.f32 %v2197_v18, %v3168_v33  ;;  %v3171_v16 = vpop.eup %2535  ;;  %v2551_v18 = vld [vmem:[#allocation7 + $0x90] sm:$0xff]   ;;  %v3401_v48 = vld [vmem:[#allocation21_spill] sm:$0xff] }
 0x154   :  { %v471_v14 = vmul.f32 %v3171_v16, %v3092_v37  ;;  %v470_v40 = vmul.f32 %v3171_v16, %v3086_v30  ;;  %v475_v63 = vmul.f32 %v3171_v16, %v3106_v35  ;;  %v3400_v1 = vld [vmem:[#allocation20_spill] sm:$0xff]  ;;  %v477_v55 = vmul.f32 %v3171_v16, %v3116_v51  ;;  %v3407_v51 = vld [vmem:[#allocation47_spill] sm:$0xff] }
 0x155   :  { %v951_v59 = vadd.f32 %v2219_v57, %v911_v53  ;;  %v2552_v57 = vld [vmem:[#allocation7 + $0xd8] sm:$0xff]   ;;  %v3402_v53 = vld [vmem:[#allocation22_spill] sm:$0xff] }
 0x156   :  { %v1142_v11 = vmul.f32 10.0, %v471_v14  ;;  %v1141_v15 = vmul.f32 10.0, %v470_v40  ;;  %v1146_v17 = vmul.f32 10.0, %v475_v63  ;;  %v3404_v14 = vld [vmem:[#allocation24_spill] sm:$0xff]  ;;  %v3406_v40 = vld [vmem:[#allocation27_spill] sm:$0xff] }
 0x158   :  { %v1150_v2 = vadd.f32 %v1142_v11, %v2926_v41  ;;  %v1149_v20 = vadd.f32 %v1141_v15, %v2930_v43  ;;  %v1154_v22 = vadd.f32 %v1146_v17, %v3061_v28  ;;  %v473_v28 = vmul.f32 %v3171_v16, %v3096_v0  ;;  %v3408_v15 = vld [vmem:[#allocation26_spill] sm:$0xff]  ;;  %v3409_v17 = vld [vmem:[#allocation28_spill] sm:$0xff] }
 0x159   :  { %v474_v43 = vmul.f32 %v3171_v16, %v3099_v12 }
 0x15a   :  { %v1158_v19 = vpack.c.bf16 %v1150_v2, %v1150_v2  ;;  %v1157_v4 = vpack.c.bf16 %v1149_v20, %v1149_v20  ;;  %v1162_v24 = vpack.c.bf16 %v1154_v22, %v1154_v22  ;;  %v3411_v20 = vld [vmem:[#allocation30_spill] sm:$0xff]  ;;  %v3412_v22 = vld [vmem:[#allocation31_spill] sm:$0xff] }
 0x15b   :  { %v1145_v0 = vmul.f32 10.0, %v474_v43  ;;  %v3419_v43 = vld [vmem:[#allocation38_spill] sm:$0xff] }
 0x15c   :  { %1197 = vmatprep.mubr.bf16.mxu1 %v1158_v19  ;;  %v3413_v19 = vld [vmem:[#allocation32_spill] sm:$0xff] }
 0x15d   :  { %1198 = vmatmul.mubr.bf16.vlgmr.msra.gmra.mrb[8].mxu1 %v1157_v4  ;;  %v1153_v46 = vadd.f32 %v1145_v0, %v3394_v26  ;;  %v3414_v4 = vld [vmem:[#allocation33_spill] sm:$0xff] }
 0x15e   :  { %2321 = vmatpush3.bf16.msra.mxu1 %v2948_v52  ;;  %1277 = vmatprep.mubr.bf16.mxu1 %v1162_v24  ;;  %v3416_v24 = vld [vmem:[#allocation35_spill] sm:$0xff] }
 0x15f   :  { %2322 = vmatprep.subr.bf16.mxu1 %v2955_v54  ;;  %v1161_v38 = vpack.c.bf16 %v1153_v46, %v1153_v46 }
 0x162   :  { %2323 = vmatpush3.bf16.msra.mxu1 %v2961_v56 }
 0x163   :  { %2324 = vmatprep.subr.bf16.mxu1 %v2967_v58 }
 0x166   :  { %2325 = vmatpush3.bf16.msra.mxu1 %v2975_v62 }
 0x167   :  { %2326 = vmatprep.subr.bf16.mxu1 %v2983_v6  ;;  %v1144_v6 = vmul.f32 10.0, %v473_v28  ;;  %v3417_v28 = vld [vmem:[#allocation36_spill] sm:$0xff] }
 0x169   :  { %v1152_v12 = vadd.f32 %v1144_v6, %v2928_v42  ;;  %v2549_v42 = vld [vmem:[#allocation7 + $0x88] sm:$0xff]   ;;  %v3424_v6 = vld [vmem:[#allocation49_spill] sm:$0xff] }
 0x16a   :  { %2327 = vmatpush3.bf16.msra.mxu1 %v2993_v21 }
 0x16b   :  { %2328 = vmatprep.subr.bf16.mxu1 %v3002_v47  ;;  %v1160_v60 = vpack.c.bf16 %v1152_v12, %v1152_v12 }
 0x16e   :  { %2329 = vmatpush3.bf16.msra.mxu1 %v3012_v44 }
 0x16f   :  { %v2239_v41 = vpop.f32.mrb[4].mxu0  ;;  %2330 = vmatprep.subr.bf16.mxu1 %v3021_v45 }
 0x170   :  { %v2261_v52 = vpop.f32.mrb[4].mxu1  ;;  %v2240_v54 = vpop.f32.mrb[5].mxu0 }
 0x171   :  { %v2241_v56 = vadd.f32 %v2240_v54, %v2239_v41  ;;  %v2262_v58 = vpop.f32.mrb[5].mxu1  ;;  %v2242_v62 = vpop.f32.mrb[6].mxu0  ;;  %v3418_v41 = vld [vmem:[#allocation37_spill] sm:$0xff]  ;;  %v3421_v54 = vld [vmem:[#allocation40_spill] sm:$0xff] }
 0x172   :  { %v2263_v21 = vadd.f32 %v2262_v58, %v2261_v52  ;;  %v2264_v30 = vpop.f32.mrb[6].mxu1  ;;  %v2243_v47 = vpop.f32.mrb[7].mxu0  ;;  %2331 = vmatpush3.bf16.msra.mxu1 %v3029_v32  ;;  %v2548_v32 = vld [vmem:[#allocation7 + $0xc8] sm:$0xff]   ;;  %v476_v52 = vmul.f32 %v3171_v16, %v3108_v5  ;;  %v3422_v58 = vld [vmem:[#allocation42_spill] sm:$0xff]  ;;  %v3423_v62 = vld [vmem:[#allocation44_spill] sm:$0xff] }
 0x173   :  { %v991_v37 = vadd.f32 %v2241_v56, %v951_v59  ;;  %v2265_v35 = vpop.f32.mrb[7].mxu1  ;;  %2332 = vmatprep.subr.bf16.mxu1 %v3036_v8  ;;  %v2550_v8 = vld [vmem:[#allocation7 + $0xd0] sm:$0xff]   ;;  %v3425_v30 = vld [vmem:[#allocation46_spill] sm:$0xff] }
 0x174   :  { %v1147_v56 = vmul.f32 10.0, %v476_v52  ;;  %v250_v52 = vld [vmem:[#allocation10] sm:$0xff] }
 0x175   :  { %v1031_v13 = vadd.f32 %v2263_v21, %v991_v37 }
 0x176   :  { %2333 = vmatpush3.bf16.msra.mxu1 %v3395_v23  ;;  %v1155_v21 = vadd.f32 %v1147_v56, %v3424_v6  ;;  %v258_v6 = vld [vmem:[#allocation10 + $0x40] sm:$0xff] }
 0x177   :  { %v1036_v44 = vmax.f32 %v1031_v13, 0.0  ;;  %2334 = vmatprep.subr.bf16.mxu1 %v3396_v61  ;;  %v2086_v13 = vld [vmem:[%s3324_s5] ss:$0 sm:$0xff]  ;;  %s2713_s5 = smov [#allocation13]  }
 0x178   :  { %v1163_v47 = vpack.c.bf16 %v1155_v21, %v1155_v21  ;;  %v262_v21 = vld [vmem:[#allocation10 + $0x60] sm:$0xff]  ;;  %s2002_s24 = sshll.u32 %s2713_s5, 4  ;;  %s2003_s24 = int_to_ptr.vmem [resolvable:$true] %s2002_s24 }
 0x179   :  { %v1037_v45 = vpack.c.bf16 %v1036_v44, %v1036_v44  ;;  %s2671_s25 = scalar_lea.vmem %s2003_s24, 1024  ;;  %p2676_p13 = scmp.lt.s32.totalorder %s2003_s24, %s2003_s24 }
 0x17a   :  { %2335 = vmatpush3.bf16.msra.mxu1 %v3397_v10  ;;  %p2672_p12 = scmp.ne.s32.totalorder %s2003_s24, %s2671_s25  ;;  %p2677_p0 = scmp.lt.s32.totalorder %s2671_s25, %s2671_s25 }
 0x17b   :  { %2399 = vmatmul.mubr.bf16.vlgmr.msra.gmra.mrb[8].mxu0 %v1037_v45  ;;  %2402 = vmatprep.subr.bf16.mxu1 %v2710_v25 }
 0x17c   :  { %2299 = vmatpush3.bf16.msra.mxu0 %v2547_v7  ;;  %1237 = vmatprep.mubr.bf16.mxu0 %v1160_v60  ;;  %p2678_p1 = por %p2677_p0, %p2676_p13 }
 0x17d   :  { %2300 = vmatprep.subr.bf16.mxu0 %v2548_v32  ;;  %1278 = vmatmul.mubr.bf16.vlgmr.msra.gmra.mrb[12].mxu1 %v1161_v38 }
 0x17e   :  { %2403 = vmatpush3.bf16.msra.mxu1 %v3130_v29  ;;  %2418 = vmatprep.mubr.msk.bf16.mxu1 %vm2711_vm0, %v2710_v25  ;;  %v3399_v29 = vld [vmem:[#allocation19_spill] sm:$0xff]  ;;  %p2679_p2 = pnand %p2678_p1, %p2672_p12 }
 0x17f   :  { %2404 = vmatprep.subr.bf16.mxu1 %v2710_v25 }
 0x180   :  { %2301 = vmatpush3.bf16.msra.mxu0 %v2549_v42 }
 0x181   :  { %2302 = vmatprep.subr.bf16.mxu0 %v2550_v8 }
 0x182   :  { %2405 = vmatpush3.bf16.msra.mxu1 %v3134_v31  ;;  %v472_v31 = vmul.f32 %v3171_v16, %v3094_v27  ;;  %v3405_v27 = vld [vmem:[#allocation25_spill] sm:$0xff] }
 0x183   :  { %2406 = vmatprep.subr.bf16.mxu1 %v2710_v25 }
 0x184   :  { %2303 = vmatpush3.bf16.msra.mxu0 %v2551_v18  ;;  %v1143_v59 = vmul.f32 10.0, %v472_v31 }
 0x185   :  { %2304 = vmatprep.subr.bf16.mxu0 %v2552_v57 }
 0x186   :  { %2407 = vmatpush3.bf16.msra.mxu1 %v3138_v34  ;;  %v3403_v34 = vld [vmem:[#allocation23_spill] sm:$0xff]  ;;  %v1151_v63 = vadd.f32 %v1143_v59, %v3406_v40 }
 0x187   :  { %2408 = vmatprep.subr.bf16.mxu1 %v2710_v25 }
 0x188   :  { %2305 = vmatpush3.bf16.msra.mxu0 %v3398_v9 }
 0x189   :  { %2306 = vmatprep.subr.bf16.mxu0 %v3399_v29 }
 0x18a   :  { %2409 = vmatpush3.bf16.msra.mxu1 %v3142_v36  ;;  %v1148_v36 = vmul.f32 10.0, %v477_v55 }
 0x18b   :  { %2410 = vmatprep.subr.bf16.mxu1 %v2710_v25 }
 0x18c   :  { %2307 = vmatpush3.bf16.msra.mxu0 %v3400_v1  ;;  %v1156_v11 = vadd.f32 %v1148_v36, %v3407_v51 }
 0x18d   :  { %2308 = vmatprep.subr.bf16.mxu0 %v3401_v48 }
 0x18e   :  { %2411 = vmatpush3.bf16.msra.mxu1 %v3146_v39  ;;  %v1159_v39 = vpack.c.bf16 %v1151_v63, %v1151_v63  ;;  %v1164_v2 = vpack.c.bf16 %v1156_v11, %v1156_v11 }
 0x18f   :  { %2412 = vmatprep.subr.bf16.mxu1 %v2710_v25 }
 0x190   :  { %2309 = vmatpush3.bf16.msra.mxu0 %v3402_v53 }
 0x191   :  { %2310 = vmatprep.subr.bf16.mxu0 %v3403_v34 }
 0x192   :  { %2413 = vmatpush3.bf16.msra.mxu1 %v3151_v50  ;;  %v3410_v50 = vld [vmem:[#allocation29_spill] sm:$0xff] }
 0x193   :  { %2414 = vmatprep.subr.bf16.mxu1 %v2710_v25 }
 0x194   :  { %2311 = vmatpush3.bf16.msra.mxu0 %v3404_v14 }
 0x195   :  { %2312 = vmatprep.subr.bf16.mxu0 %v3405_v27 }
 0x196   :  { %2415 = vmatpush3.bf16.msra.mxu1 %v3155_v3  ;;  %v3415_v3 = vld [vmem:[#allocation34_spill] sm:$0xff] }
 0x197   :  { %2416 = vmatprep.subr.bf16.mxu1 %v2710_v25 }
 0x198   :  { %2313 = vmatpush3.bf16.msra.mxu0 %v3408_v15 }
 0x199   :  { %2342 = vmatprep.subr.bf16.mxu0 %v3409_v17  ;;  %v2527_v17 = vld [vmem:[#allocation12] sm:$0xff]  }
 0x19a   :  { %2417 = vmatpush3.bf16.msra.mxu1 %v3159_v49  ;;  %v3420_v49 = vld [vmem:[#allocation39_spill] sm:$0xff] }
 0x19b   :  { %1238 = vmatmul.mubr.bf16.vlgmr.msra.gmra.mrb[12].mxu0 %v1159_v39 }
 0x19c   :  { %2343 = vmatpush3.bf16.msra.mxu0 %v3410_v50  ;;  %1317 = vmatprep.mubr.bf16.mxu0 %v1164_v2  ;;  %v2528_v2 = vld [vmem:[#allocation12 + $0x8] sm:$0xff]   ;;  %v2529_v50 = vld [vmem:[#allocation12 + $0x10] sm:$0xff]  }
 0x19d   :  { %2344 = vmatprep.subr.bf16.mxu0 %v3411_v20  ;;  %v2530_v20 = vld [vmem:[#allocation12 + $0x18] sm:$0xff]  }
 0x1a0   :  { %2345 = vmatpush3.bf16.msra.mxu0 %v3412_v22 }
 0x1a1   :  { %2346 = vmatprep.subr.bf16.mxu0 %v3413_v19 }
 0x1a4   :  { %2347 = vmatpush3.bf16.msra.mxu0 %v3414_v4 }
 0x1a5   :  { %2348 = vmatprep.subr.bf16.mxu0 %v3415_v3 }
 0x1a8   :  { %2349 = vmatpush3.bf16.msra.mxu0 %v3416_v24  ;;  %v2531_v24 = vld [vmem:[#allocation12 + $0x20] sm:$0xff]  }
 0x1a9   :  { %2350 = vmatprep.subr.bf16.mxu0 %v3417_v28  ;;  %v2532_v28 = vld [vmem:[#allocation12 + $0x28] sm:$0xff]  }
 0x1ac   :  { %2351 = vmatpush3.bf16.msra.mxu0 %v3418_v41  ;;  %v2533_v41 = vld [vmem:[#allocation12 + $0x30] sm:$0xff]  }
 0x1ad   :  { %2352 = vmatprep.subr.bf16.mxu0 %v3419_v43  ;;  %v2534_v43 = vld [vmem:[#allocation12 + $0x38] sm:$0xff]  }
 0x1b0   :  { %2353 = vmatpush3.bf16.msra.mxu0 %v3420_v49  ;;  %v254_v49 = vld [vmem:[#allocation10 + $0x20] sm:$0xff] }
 0x1b1   :  { %2354 = vmatprep.subr.bf16.mxu0 %v3421_v54  ;;  %v3278_v54 = vld [vmem:[#allocation10 + $0x8] sm:$0xff]  ;;  %v2103_v56 = vcombine.low %v250_v52, %v254_v49 }
 0x1b4   :  { %2355 = vmatpush3.bf16.msra.mxu0 %v3422_v58  ;;  %v2104_v58 = vcombine.high %v250_v52, %v254_v49  ;;  %v299_v52 = vld [vmem:[#allocation10 + $0x188] sm:$0xff] }
 0x1b5   :  { %2356 = vmatprep.subr.bf16.mxu0 %v3423_v62  ;;  %v3280_v62 = vld [vmem:[#allocation10 + $0x28] sm:$0xff] }
 0x1b6   :  { %1789 = vmatprep.subr.bf16.mxu1 %v2104_v58  ;;  %v303_v49 = vld [vmem:[#allocation10 + $0x1a8] sm:$0xff] }
 0x1b7   :  { %v307_v58 = vld [vmem:[#allocation10 + $0x1c8] sm:$0xff] }
 0x1b8   :  { %2357 = vmatpush3.bf16.msra.mxu0 %v3425_v30  ;;  %v2105_v30 = vcombine.low %v3278_v54, %v3280_v62 }
 0x1b9   :  { %2422 = vmatprep.subr.bf16.mxu0 %v2710_v25 }
 0x1bb   :  { %1318 = vmatmul.mubr.bf16.vlgmr.msra.gmra.mrb[16].mxu0 %v1163_v47  ;;  %v2106_v47 = vcombine.high %v3278_v54, %v3280_v62  ;;  %v311_v62 = vld [vmem:[#allocation10 + $0x1e8] sm:$0xff] }
 0x1bc   :  { %2438 = vmatprep.mubr.msk.bf16.mxu0 %vm2711_vm0, %v2710_v25  ;;  %2423 = vmatpush3.bf16.msra.mxu0 %v2527_v17 }
 0x1bd   :  { %2424 = vmatprep.subr.bf16.mxu0 %v2710_v25 }
 0x1c0   :  { %2425 = vmatpush3.bf16.msra.mxu0 %v2528_v2  ;;  %v275_v2 = vld [vmem:[#allocation10 + $0xc8] sm:$0xff] }
 0x1c1   :  { %2426 = vmatprep.subr.bf16.mxu0 %v2710_v25 }
 0x1c4   :  { %2427 = vmatpush3.bf16.msra.mxu0 %v2529_v50  ;;  %v279_v50 = vld [vmem:[#allocation10 + $0xe8] sm:$0xff] }
 0x1c5   :  { %2428 = vmatprep.subr.bf16.mxu0 %v2710_v25 }
 0x1c8   :  { %2429 = vmatpush3.bf16.msra.mxu0 %v2530_v20 }
 0x1c9   :  { %2430 = vmatprep.subr.bf16.mxu0 %v2710_v25 }
 0x1cc   :  { %2431 = vmatpush3.bf16.msra.mxu0 %v2531_v24  ;;  %v291_v24 = vld [vmem:[#allocation10 + $0x148] sm:$0xff] }
 0x1cd   :  { %2432 = vmatprep.subr.bf16.mxu0 %v2710_v25 }
 0x1d0   :  { %2433 = vmatpush3.bf16.msra.mxu0 %v2532_v28  ;;  %v295_v28 = vld [vmem:[#allocation10 + $0x168] sm:$0xff] }
 0x1d1   :  { %2434 = vmatprep.subr.bf16.mxu0 %v2710_v25  ;;  %v2145_v54 = vcombine.low %v291_v24, %v295_v28 }
 0x1d4   :  { %2435 = vmatpush3.bf16.msra.mxu0 %v2533_v41 }
 0x1d5   :  { %2436 = vmatprep.subr.bf16.mxu0 %v2710_v25  ;;  %v2111_v25 = vcombine.low %v258_v6, %v262_v21 }
 0x1d8   :  { %2437 = vmatpush3.bf16.msra.mxu0 %v2534_v43  ;;  %v2146_v43 = vcombine.high %v291_v24, %v295_v28 }
 0x1d9   :  { %1830 = vmatprep.subr.bf16.mxu0 %v2106_v47  ;;  %v252_v47 = vld [vmem:[#allocation10 + $0x10] sm:$0xff] }
 0x230   :  { %v2292_v5 = vpop.f32.mrb[8].mxu1 }
 0x231   :  { %v2293_v16 = vpop.f32.mrb[9].mxu1 }
 0x232   :  { %v2294_v37 = vadd.f32 %v2293_v16, %v2292_v5  ;;  %v2295_v35 = vpop.f32.mrb[10].mxu1  ;;  %v2112_v5 = vcombine.high %v258_v6, %v262_v21  ;;  %v266_v16 = vld [vmem:[#allocation10 + $0x80] sm:$0xff]  ;;  %v2153_v6 = vcombine.low %v299_v52, %v303_v49  ;;  %v2162_v21 = vcombine.high %v307_v58, %v311_v62 }
 0x233   :  { %v2296_v0 = vpop.f32.mrb[11].mxu1 }
 0x234   :  { %v1200_v10 = vadd.f32 %v2294_v37, %v3168_v33  ;;  %v270_v37 = vld [vmem:[#allocation10 + $0xa0] sm:$0xff] }
 0x235   :  { %v2120_v35 = vcombine.high %v266_v16, %v270_v37  ;;  %v2119_v0 = vcombine.low %v266_v16, %v270_v37  ;;  %v257_v37 = vld [vmem:[#allocation10 + $0x38] sm:$0xff] }
 0x24e   :  { %v1126_v12 = vpop.f32.mrb[8].mxu0 }
 0x24f   :  { %v1127_v44 = vadd.f32 %v2086_v13, %v1126_v12  ;;  %v2400_v26 = vpop.f32.mrb[9].mxu0  ;;  %v278_v12 = vld [vmem:[#allocation10 + $0xe0] sm:$0xff] }
 0x250   :  { %v1129_v46 = vpop.f32.mrb[10].mxu0  ;;  %v2336_v45 = vpop.f32.mrb[12].mxu1 }
 0x251   :  { %1132 = vmax.xlane.f32.xlu0 %v1127_v44  ;;  %v2401_v23 = vpop.f32.mrb[11].mxu0  ;;  %v2337_v61 = vpop.f32.mrb[13].mxu1  ;;  %v282_v46 = vld [vmem:[#allocation10 + $0x100] sm:$0xff] }
 0x252   :  { %v2338_v60 = vadd.f32 %v2337_v61, %v2336_v45  ;;  %v2339_v38 = vpop.f32.mrb[14].mxu1  ;;  %v286_v23 = vld [vmem:[#allocation10 + $0x120] sm:$0xff] }
 0x253   :  { %v2340_v7 = vpop.f32.mrb[15].mxu1  ;;  %v2136_v45 = vcombine.high %v282_v46, %v286_v23  ;;  %v2135_v61 = vcombine.low %v282_v46, %v286_v23  ;;  %v294_v38 = vld [vmem:[#allocation10 + $0x160] sm:$0xff]  ;;  %v261_v46 = vld [vmem:[#allocation10 + $0x58] sm:$0xff] }
 0x254   :  { %v265_v23 = vld [vmem:[#allocation10 + $0x78] sm:$0xff] }
 0x26e   :  { %v2314_v32 = vpop.f32.mrb[12].mxu0 }
 0x26f   :  { %v2315_v42 = vpop.f32.mrb[13].mxu0 }
 0x270   :  { %v2316_v8 = vadd.f32 %v2315_v42, %v2314_v32  ;;  %v2317_v18 = vpop.f32.mrb[14].mxu0  ;;  %v298_v32 = vld [vmem:[#allocation10 + $0x180] sm:$0xff] }
 0x271   :  { %v2318_v57 = vpop.f32.mrb[15].mxu0  ;;  %v302_v42 = vld [vmem:[#allocation10 + $0x1a0] sm:$0xff] }
 0x272   :  { %v1240_v9 = vadd.f32 %v2316_v8, %v1200_v10  ;;  %v2152_v8 = vcombine.high %v298_v32, %v302_v42  ;;  %v2151_v18 = vcombine.low %v298_v32, %v302_v42  ;;  %v306_v57 = vld [vmem:[#allocation10 + $0x1c0] sm:$0xff]  ;;  %v268_v32 = vld [vmem:[#allocation10 + $0x90] sm:$0xff] }
 0x274   :  { %v1280_v29 = vadd.f32 %v2338_v60, %v1240_v9  ;;  %v290_v60 = vld [vmem:[#allocation10 + $0x140] sm:$0xff] }
 0x275   :  { %v2144_v7 = vcombine.high %v290_v60, %v294_v38  ;;  %v2143_v10 = vcombine.low %v290_v60, %v294_v38  ;;  %v310_v9 = vld [vmem:[#allocation10 + $0x1e0] sm:$0xff] }
 0x28e   :  { %v2358_v1 = vpop.f32.mrb[16].mxu0 }
 0x28f   :  { %v2359_v48 = vpop.f32.mrb[17].mxu0 }
 0x290   :  { %v2360_v31 = vadd.f32 %v2359_v48, %v2358_v1  ;;  %v2361_v55 = vpop.f32.mrb[18].mxu0  ;;  %v2159_v1 = vcombine.low %v306_v57, %v310_v9 }
 0x291   :  { %v2362_v53 = vpop.f32.mrb[19].mxu0 }
 0x292   :  { %v3262_v34 = vadd.f32 %v2360_v31, %v1280_v29  ;;  %v2160_v29 = vcombine.high %v306_v57, %v310_v9  ;;  %v273_v57 = vld [vmem:[#allocation10 + $0xb8] sm:$0xff] }
 0x294   :  { %v1325_v59 = vmax.f32 %v3262_v34, 0.0  ;;  %vm1466_vm1 = vcmp.gt.f32.partialorder %v3262_v34, 0.0 }
 0x295   :  { %vm3289_vm2 = vmpackc.low %vm1466_vm1, %vm1466_vm1 }
 0x296   :  { %v1326_v36 = vpack.c.bf16 %v1325_v59, %v1325_v59 }
 0x298   :  { %2419 = vmatmul.mubr.bf16.vlgmr.msra.gmra.mrb[16].mxu1 %v1326_v36 }
 0x299   :  { %1790 = vmatpush1.bf16.msra.mxu1 %v2103_v56  ;;  %v2154_v56 = vcombine.high %v299_v52, %v303_v49  ;;  %v301_v52 = vld [vmem:[#allocation10 + $0x198] sm:$0xff] }
 0x29a   :  { %1791 = vmatprep.subr.bf16.mxu1 %v2112_v5  ;;  %v256_v5 = vld [vmem:[#allocation10 + $0x30] sm:$0xff]  ;;  %v305_v49 = vld [vmem:[#allocation10 + $0x1b8] sm:$0xff] }
 0x29b   :  { %v2108_v16 = vcombine.high %v252_v47, %v256_v5 }
 0x29d   :  { %1792 = vmatpush1.bf16.msra.mxu1 %v2111_v25  ;;  %v253_v25 = vld [vmem:[#allocation10 + $0x18] sm:$0xff] }
 0x29e   :  { %1793 = vmatprep.subr.bf16.mxu1 %v2120_v35  ;;  %v2107_v35 = vcombine.low %v252_v47, %v256_v5  ;;  %v313_v47 = vld [vmem:[#allocation10 + $0x1f8] sm:$0xff] }
 0x2a1   :  { %1794 = vmatpush1.bf16.msra.mxu1 %v2119_v0  ;;  %v2109_v0 = vcombine.low %v253_v25, %v257_v37 }
 0x2de   :  { %v1133_v14 = vpop.xlane.xlu0 %1132 }
 0x2df   :  { %v1134_v33 = vsub.f32 %v1127_v44, %v1133_v14  ;;  %v259_v14 = vld [vmem:[#allocation10 + $0x48] sm:$0xff] }
 0x2e1   :  { %v1135_v27 = vmul.f32 1.442695, %v1134_v33  ;;  %v263_v33 = vld [vmem:[#allocation10 + $0x68] sm:$0xff] }
 0x2e3   :  { %2537 = vpow2.f32 %v1135_v27 }
 0x2ed   :  { %v3265_v39 = vpop.eup %2537 }
 0x36b   :  { %v1361_v40 = vpop.f32.mrb[16].mxu1 }
 0x36c   :  { %v1362_v63 = vadd.f32 %v2086_v13, %v1361_v40  ;;  %v2420_v51 = vpop.f32.mrb[17].mxu1  ;;  %v274_v13 = vld [vmem:[#allocation10 + $0xc0] sm:$0xff] }
 0x36d   :  { %v1364_v11 = vpop.f32.mrb[18].mxu1  ;;  %v2128_v44 = vcombine.high %v274_v13, %v278_v12  ;;  %v2127_v26 = vcombine.low %v274_v13, %v278_v12  ;;  %v267_v51 = vld [vmem:[#allocation10 + $0x88] sm:$0xff]  ;;  %v2110_v13 = vcombine.high %v253_v25, %v257_v37  ;;  %v2712_v12 = vmov 0  }
 0x36e   :  { %1367 = vmax.xlane.f32.xlu1 %v1362_v63  ;;  %v2421_v15 = vpop.f32.mrb[19].mxu1  ;;  %v271_v11 = vld [vmem:[#allocation10 + $0xa8] sm:$0xff]  ;;  %1821 = vmatprep.mubr.bf16.mxu1 %v2712_v12  ;;  %v2157_v25 = vcombine.low %v301_v52, %v305_v49 }
 0x36f   :  { %1795 = vmatprep.subr.bf16.mxu1 %v2128_v44  ;;  %v2113_v15 = vcombine.low %v259_v14, %v263_v33  ;;  %v2122_v17 = vcombine.high %v267_v51, %v271_v11  ;;  %v2121_v20 = vcombine.low %v267_v51, %v271_v11  ;;  %v260_v44 = vld [vmem:[#allocation10 + $0x50] sm:$0xff]  ;;  %v285_v51 = vld [vmem:[#allocation10 + $0x118] sm:$0xff] }
 0x370   :  { %1796 = vmatpush1.bf16.msra.mxu1 %v2127_v26  ;;  %v264_v26 = vld [vmem:[#allocation10 + $0x70] sm:$0xff]  ;;  %v289_v11 = vld [vmem:[#allocation10 + $0x138] sm:$0xff] }
 0x371   :  { %1797 = vmatprep.subr.bf16.mxu1 %v2136_v45  ;;  %v2115_v34 = vcombine.low %v260_v44, %v264_v26 }
 0x372   :  { %1137 = vadd.xlane.f32.xlu1 %v3265_v39 }
 0x374   :  { %1798 = vmatpush1.bf16.msra.mxu1 %v2135_v61 }
 0x375   :  { %1799 = vmatprep.subr.bf16.mxu1 %v2144_v7  ;;  %v2116_v7 = vcombine.high %v260_v44, %v264_v26 }
 0x378   :  { %1800 = vmatpush1.bf16.msra.mxu1 %v2143_v10  ;;  %v2118_v10 = vcombine.high %v261_v46, %v265_v23 }
 0x379   :  { %1801 = vmatprep.subr.bf16.mxu1 %v2152_v8  ;;  %v272_v8 = vld [vmem:[#allocation10 + $0xb0] sm:$0xff] }
 0x37c   :  { %1802 = vmatpush1.bf16.msra.mxu1 %v2151_v18  ;;  %v269_v18 = vld [vmem:[#allocation10 + $0x98] sm:$0xff] }
 0x37d   :  { %1803 = vmatprep.subr.bf16.mxu1 %v2160_v29  ;;  %v2117_v29 = vcombine.low %v261_v46, %v265_v23 }
 0x380   :  { %1804 = vmatpush1.bf16.msra.mxu1 %v2159_v1  ;;  %v2124_v1 = vcombine.high %v268_v32, %v272_v8 }
 0x381   :  { %1871 = vmatprep.subr.bf16.mxu1 %v2108_v16 }
 0x3fb   :  { %v1368_v22 = vpop.xlane.xlu1 %1367 }
 0x3fc   :  { %v1369_v19 = vsub.f32 %v1362_v63, %v1368_v22  ;;  %v2114_v63 = vcombine.high %v259_v14, %v263_v33  ;;  %v283_v22 = vld [vmem:[#allocation10 + $0x108] sm:$0xff]  ;;  %v2125_v14 = vcombine.low %v269_v18, %v273_v57 }
 0x3fe   :  { %v1370_v4 = vmul.f32 1.442695, %v1369_v19  ;;  %v287_v19 = vld [vmem:[#allocation10 + $0x128] sm:$0xff] }
 0x3ff   :  { %v1138_v48 = vpop.xlane.xlu1 %1137  ;;  %v2137_v41 = vcombine.low %v283_v22, %v287_v19 }
 0x400   :  { %2539 = vpow2.f32 %v1370_v4  ;;  %v2129_v4 = vcombine.low %v275_v2, %v279_v50 }
 0x401   :  { %2541 = vrcp.f32 %v1138_v48  ;;  %v2126_v48 = vcombine.high %v269_v18, %v273_v57 }
 0x40a   :  { %v3272_v3 = vpop.eup %2539 }
 0x40b   :  { %1372 = vadd.xlane.f32.xlu0 %v3272_v3  ;;  %v2542_v55 = vpop.eup %2541 }
 0x40c   :  { %v1140_v59 = vmul.f32 %v2542_v55, %v3265_v39  ;;  %v2130_v39 = vcombine.high %v275_v2, %v279_v50  ;;  %v280_v55 = vld [vmem:[#allocation10 + $0xf0] sm:$0xff]  ;;  %v2142_v50 = vcombine.high %v285_v51, %v289_v11 }
 0x498   :  { %v1373_v31 = vpop.xlane.xlu0 %1372 }
 0x499   :  { %2543 = vrcp.f32 %v1373_v31  ;;  %v276_v31 = vld [vmem:[#allocation10 + $0xd0] sm:$0xff] }
 0x49a   :  { %v2132_v33 = vcombine.high %v276_v31, %v280_v55 }
 0x4a3   :  { %v2544_v53 = vpop.eup %2543 }
 0x4a4   :  { %v1375_v36 = vmul.f32 %v2544_v53, %v3272_v3  ;;  %v2138_v3 = vcombine.high %v283_v22, %v287_v19  ;;  %v277_v53 = vld [vmem:[#allocation10 + $0xd8] sm:$0xff] }
 0x4a5   :  { %v293_v22 = vld [vmem:[#allocation10 + $0x158] sm:$0xff] }
 0x4a6   :  { %v1376_v27 = vsub.f32 %v1375_v36, %v1140_v59  ;;  %v281_v59 = vld [vmem:[#allocation10 + $0xf8] sm:$0xff]  ;;  %v2123_v36 = vcombine.low %v268_v32, %v272_v8 }
 0x4a7   :  { %v297_v19 = vld [vmem:[#allocation10 + $0x178] sm:$0xff] }
 0x4a8   :  { %v1377_v40 = vpack.c.bf16 %v1376_v27, %v1376_v27  ;;  %v2134_v27 = vcombine.high %v277_v53, %v281_v59  ;;  %v2150_v28 = vcombine.high %v293_v22, %v297_v19 }
 0x4aa   :  { %2439 = vmatmul.mubr.bf16.vlgmr.msra.gmra.mrb[20].mxu0 %v1377_v40  ;;  %v284_v40 = vld [vmem:[#allocation10 + $0x110] sm:$0xff] }
 0x4ab   :  { %1831 = vmatpush1.bf16.msra.mxu0 %v2105_v30  ;;  %v2161_v30 = vcombine.low %v307_v58, %v311_v62  ;;  %1862 = vmatprep.mubr.bf16.mxu0 %v2712_v12  ;;  %v2158_v62 = vcombine.high %v301_v52, %v305_v49  ;;  %v2556_v52 = vld [vmem:[#allocation4 + $0x18] sm:$0xff] }
 0x4ac   :  { %1832 = vmatprep.subr.bf16.mxu0 %v2114_v63  ;;  %v288_v63 = vld [vmem:[#allocation10 + $0x130] sm:$0xff] }
 0x4ad   :  { %v2140_v2 = vcombine.high %v284_v40, %v288_v63 }
 0x4af   :  { %1833 = vmatpush1.bf16.msra.mxu0 %v2113_v15  ;;  %v2131_v15 = vcombine.low %v276_v31, %v280_v55 }
 0x4b0   :  { %1834 = vmatprep.subr.bf16.mxu0 %v2122_v17  ;;  %v2133_v17 = vcombine.low %v277_v53, %v281_v59 }
 0x4b3   :  { %1835 = vmatpush1.bf16.msra.mxu0 %v2121_v20  ;;  %v292_v20 = vld [vmem:[#allocation10 + $0x150] sm:$0xff] }
 0x4b4   :  { %1836 = vmatprep.subr.bf16.mxu0 %v2130_v39  ;;  %v296_v39 = vld [vmem:[#allocation10 + $0x170] sm:$0xff] }
 0x4b5   :  { %v2148_v24 = vcombine.high %v292_v20, %v296_v39 }
 0x4b7   :  { %1837 = vmatpush1.bf16.msra.mxu0 %v2129_v4  ;;  %v2139_v4 = vcombine.low %v284_v40, %v288_v63 }
 0x4b8   :  { %1838 = vmatprep.subr.bf16.mxu0 %v2138_v3  ;;  %v2141_v3 = vcombine.low %v285_v51, %v289_v11 }
 0x4bb   :  { %1839 = vmatpush1.bf16.msra.mxu0 %v2137_v41  ;;  %v300_v41 = vld [vmem:[#allocation10 + $0x190] sm:$0xff] }
 0x4bc   :  { %1840 = vmatprep.subr.bf16.mxu0 %v2146_v43  ;;  %v304_v43 = vld [vmem:[#allocation10 + $0x1b0] sm:$0xff] }
 0x4bd   :  { %v2156_v58 = vcombine.high %v300_v41, %v304_v43  ;;  %v2155_v5 = vcombine.low %v300_v41, %v304_v43  ;;  %v2555_v41 = vld [vmem:[#allocation4 + $0x10] sm:$0xff] }
 0x4bf   :  { %1841 = vmatpush1.bf16.msra.mxu0 %v2145_v54  ;;  %v2147_v54 = vcombine.low %v292_v20, %v296_v39 }
 0x4c0   :  { %1842 = vmatprep.subr.bf16.mxu0 %v2154_v56  ;;  %v2149_v56 = vcombine.low %v293_v22, %v297_v19 }
 0x4c3   :  { %1843 = vmatpush1.bf16.msra.mxu0 %v2153_v6  ;;  %v308_v6 = vld [vmem:[#allocation10 + $0x1d0] sm:$0xff] }
 0x4c4   :  { %1844 = vmatprep.subr.bf16.mxu0 %v2162_v21  ;;  %v312_v21 = vld [vmem:[#allocation10 + $0x1f0] sm:$0xff] }
 0x4c5   :  { %v2164_v16 = vcombine.high %v308_v6, %v312_v21 }
 0x4c7   :  { %1845 = vmatpush1.bf16.msra.mxu0 %v2161_v30  ;;  %v309_v30 = vld [vmem:[#allocation10 + $0x1d8] sm:$0xff] }
 0x4c8   :  { %1912 = vmatprep.subr.bf16.mxu0 %v2110_v13  ;;  %v2166_v37 = vcombine.high %v309_v30, %v313_v47 }
 0x57d   :  { %v1460_v45 = vpop.f32.mrb[20].mxu0 }
 0x57e   :  { %v3293_v60 = vpack.c.bf16 %v1460_v45, %v1460_v45  ;;  %v2440_v38 = vpop.f32.mrb[21].mxu0 }
 0x57f   :  { %v1463_v42 = vpop.f32.mrb[22].mxu0 }
 0x580   :  { %v2441_v9 = vpop.f32.mrb[23].mxu0  ;;  %2169 = vmatmul.mubr.msk.bf16.vlgmr.msra.gmra.mrb[20].mxu1 %vm3289_vm2, %v3293_v60  ;;  %2172 = vmatmul.mubr.msk.bf16.vlgmr.msra.gmra.mrb[24].mxu0 %vm3289_vm2, %v3293_v60 }
 0x581   :  { %1872 = vmatpush1.bf16.msra.mxu1 %v2107_v35  ;;  %1913 = vmatpush1.bf16.msra.mxu0 %v2109_v0  ;;  %v2163_v35 = vcombine.low %v308_v6, %v312_v21  ;;  %v2165_v0 = vcombine.low %v309_v30, %v313_v47  ;;  %v2559_v6 = vld [vmem:[#allocation4 + $0x30] sm:$0xff]  ;;  %v2560_v30 = vld [vmem:[#allocation4 + $0x38] sm:$0xff] }
 0x582   :  { %1873 = vmatprep.subr.bf16.mxu1 %v2116_v7  ;;  %1914 = vmatprep.subr.bf16.mxu0 %v2118_v10 }
 0x583   :  { %1903 = vmatprep.mubr.bf16.mxu1 %v2712_v12  ;;  %1944 = vmatprep.mubr.bf16.mxu0 %v2712_v12 }
 0x585   :  { %1874 = vmatpush1.bf16.msra.mxu1 %v2115_v34  ;;  %1915 = vmatpush1.bf16.msra.mxu0 %v2117_v29 }
 0x586   :  { %1875 = vmatprep.subr.bf16.mxu1 %v2124_v1  ;;  %1916 = vmatprep.subr.bf16.mxu0 %v2126_v48 }
 0x589   :  { %1876 = vmatpush1.bf16.msra.mxu1 %v2123_v36  ;;  %1917 = vmatpush1.bf16.msra.mxu0 %v2125_v14 }
 0x58a   :  { %1877 = vmatprep.subr.bf16.mxu1 %v2132_v33  ;;  %1918 = vmatprep.subr.bf16.mxu0 %v2134_v27 }
 0x58d   :  { %1878 = vmatpush1.bf16.msra.mxu1 %v2131_v15  ;;  %1919 = vmatpush1.bf16.msra.mxu0 %v2133_v17 }
 0x58e   :  { %1879 = vmatprep.subr.bf16.mxu1 %v2140_v2  ;;  %1920 = vmatprep.subr.bf16.mxu0 %v2142_v50 }
 0x591   :  { %1880 = vmatpush1.bf16.msra.mxu1 %v2139_v4  ;;  %1921 = vmatpush1.bf16.msra.mxu0 %v2141_v3  ;;  %v2553_v4 = vld [vmem:[#allocation4] sm:$0xff] }
 0x592   :  { %1881 = vmatprep.subr.bf16.mxu1 %v2148_v24  ;;  %1922 = vmatprep.subr.bf16.mxu0 %v2150_v28  ;;  %v2554_v24 = vld [vmem:[#allocation4 + $0x8] sm:$0xff] }
 0x595   :  { %1882 = vmatpush1.bf16.msra.mxu1 %v2147_v54  ;;  %1923 = vmatpush1.bf16.msra.mxu0 %v2149_v56  ;;  %v2557_v54 = vld [vmem:[#allocation4 + $0x20] sm:$0xff] }
 0x596   :  { %1883 = vmatprep.subr.bf16.mxu1 %v2156_v58  ;;  %1924 = vmatprep.subr.bf16.mxu0 %v2158_v62  ;;  %v2558_v58 = vld [vmem:[#allocation4 + $0x28] sm:$0xff] }
 0x599   :  { %1884 = vmatpush1.bf16.msra.mxu1 %v2155_v5  ;;  %1925 = vmatpush1.bf16.msra.mxu0 %v2157_v25 }
 0x59a   :  { %1885 = vmatprep.subr.bf16.mxu1 %v2164_v16  ;;  %1926 = vmatprep.subr.bf16.mxu0 %v2166_v37 }
 0x59d   :  { %1886 = vmatpush1.bf16.msra.mxu1 %v2163_v35  ;;  %1927 = vmatpush1.bf16.msra.mxu0 %v2165_v0 }
 0x5a0   :  { %2175 = vmatmul.mubr.msk.bf16.vlgmr.msra.gmra.mrb[24].mxu1 %vm3289_vm2, %v3293_v60  ;;  %2178 = vmatmul.mubr.msk.bf16.vlgmr.msra.gmra.mrb[28].mxu0 %vm3289_vm2, %v3293_v60 }
 0x653   :  { %v1823_v13 = vpop.f32.mrb[20].mxu1  ;;  %v1864_v12 = vpop.f32.mrb[24].mxu0 }
 0x654   :  { %v1953_v44 = vmul.f32 %v1823_v13, %v1823_v13  ;;  %v1825_v26 = vpop.f32.mrb[21].mxu1  ;;  %v1866_v46 = vpop.f32.mrb[25].mxu0  ;;  %v1955_v32 = vmul.f32 %v1864_v12, %v1864_v12 }
 0x655   :  { %v1954_v23 = vmul.f32 %v1825_v26, %v1825_v26  ;;  %v1827_v45 = vpop.f32.mrb[22].mxu1  ;;  %v1868_v38 = vpop.f32.mrb[26].mxu0  ;;  %v1956_v8 = vmul.f32 %v1866_v46, %v1866_v46 }
 0x656   :  { %v1828_v7 = vpop.f32.mrb[23].mxu1  ;;  %v1869_v10 = vpop.f32.mrb[27].mxu0 }
 0x657   :  { %v1961_v42 = vadd.f32 %v1954_v23, %v1953_v44 }
 0x659   :  { %v1962_v18 = vadd.f32 %v1961_v42, %v1955_v32 }
 0x65b   :  { %v1963_v57 = vadd.f32 %v1962_v18, %v1956_v8 }
 0x673   :  { %v1905_v9 = vpop.f32.mrb[24].mxu1  ;;  %v1946_v34 = vpop.f32.mrb[28].mxu0 }
 0x674   :  { %v1957_v29 = vmul.f32 %v1905_v9, %v1905_v9  ;;  %v1907_v61 = vpop.f32.mrb[25].mxu1  ;;  %v1948_v60 = vpop.f32.mrb[29].mxu0  ;;  %v1959_v36 = vmul.f32 %v1946_v34, %v1946_v34 }
 0x675   :  { %v1958_v1 = vmul.f32 %v1907_v61, %v1907_v61  ;;  %v1909_v48 = vpop.f32.mrb[26].mxu1  ;;  %v1950_v31 = vpop.f32.mrb[30].mxu0  ;;  %v1960_v33 = vmul.f32 %v1948_v60, %v1948_v60 }
 0x676   :  { %v1964_v55 = vadd.f32 %v1963_v57, %v1957_v29  ;;  %v1910_v53 = vpop.f32.mrb[27].mxu1  ;;  %v1951_v59 = vpop.f32.mrb[31].mxu0 }
 0x678   :  { %v1965_v14 = vadd.f32 %v1964_v55, %v1958_v1 }
 0x67a   :  { %v1966_v27 = vadd.f32 %v1965_v14, %v1959_v36 }
 0x67c   :  { %v1967_v40 = vadd.f32 %v1966_v27, %v1960_v33 }
 0x67e   :  { %1968 = vadd.xlane.f32.xlu1 %v1967_v40 }
 0x70b   :  { %v1969_v63 = vpop.xlane.xlu1 %1968 }
 0x70c   :  { %v1970_v51 = vadd.f32 1e-12, %v1969_v63 }
 0x70e   :  { %2545 = vrsqrt.f32 %v1970_v51 }
 0x718   :  { %v2546_v11 = vpop.eup %2545 }
 0x719   :  { %v1972_v15 = vmul.f32 %v2546_v11, %v1823_v13  ;;  %v1973_v17 = vmul.f32 %v2546_v11, %v1825_v26  ;;  %v1974_v2 = vmul.f32 %v2546_v11, %v1864_v12  ;;  %v1975_v50 = vmul.f32 %v2546_v11, %v1866_v46 }
 0x71a   :  { %v1976_v20 = vmul.f32 %v2546_v11, %v1905_v9  ;;  %v1977_v39 = vmul.f32 %v2546_v11, %v1907_v61  ;;  %v1978_v22 = vmul.f32 %v2546_v11, %v1946_v34  ;;  %v1979_v19 = vmul.f32 %v2546_v11, %v1948_v60 }
 0x71b   :  { %v1980_v3 = vadd.f32 %v2553_v4, %v1972_v15  ;;  %v1981_v28 = vadd.f32 %v2554_v24, %v1973_v17  ;;  %v1982_v43 = vadd.f32 %v2555_v41, %v1974_v2  ;;  %v1983_v49 = vadd.f32 %v2556_v52, %v1975_v50 }
 0x71c   :  { %v1984_v56 = vadd.f32 %v2557_v54, %v1976_v20  ;;  %v1985_v62 = vadd.f32 %v2558_v58, %v1977_v39  ;;  %v1986_v21 = vadd.f32 %v2559_v6, %v1978_v22  ;;  %v1987_v47 = vadd.f32 %v2560_v30, %v1979_v19 }
 0x71d   :  { %1988 = vst [vmem:[#allocation13] sm:$0xff] %v1980_v3  ;;  %1989 = vst [vmem:[#allocation13 + $0x8] sm:$0xff] %v1981_v28 }
 0x71e   :  { %1990 = vst [vmem:[#allocation13 + $0x10] sm:$0xff] %v1982_v43  ;;  %1991 = vst [vmem:[#allocation13 + $0x18] sm:$0xff] %v1983_v49 }
 0x71f   :  { %1992 = vst [vmem:[#allocation13 + $0x20] sm:$0xff] %v1984_v56  ;;  %1993 = vst [vmem:[#allocation13 + $0x28] sm:$0xff] %v1985_v62 }
 0x720   :  { %1994 = vst [vmem:[#allocation13 + $0x30] sm:$0xff] %v1986_v21  ;;  %1995 = vst [vmem:[#allocation13 + $0x38] sm:$0xff] %v1987_v47 }
 0x721   :  { %2682 = shalt.err (!%p2679_p2)
}
 0x722   :  { %s2683_s29 = scalar_lea.hbm %s3327_s8, 1024 }
 0x723   :  { %p2684_p3 = scmp.ne.s32.totalorder %s3327_s8, %s2683_s29  ;;  %p2687_p4 = scmp.lt.u32.totalorder %s2683_s29, %s3327_s8 }
 0x725   :  { %p2689_p5 = pnand %p2687_p4, %p2684_p3 }
 0x727   :  { %2692 = shalt.err (!%p2689_p5)
}
 0x728   :  { %2005 = dma.vmem_to_hbm [thread:$0]  %s2003_s24, 1024, %s3327_s8, [#allocation6]  }
 0x729   :  { %2699 = dma.done.wait [#allocation6], 1024  }
 0x72a   :  { %2700 = vsyncadd [#allocation6], 4294966272 }
 0x72b   :  { %2009 = vsyncpa [#allocation5], 1 }
 0x72c   :  { %2010 = vsyncpa [#allocation8], 1 }
 0x72d   :  { %2011 = vsyncpa [#allocation11], 1 }
 0x72e   :  { %2012 = vsyncpa [#allocation6], 1 }

</bundles_post_ra>
